<compile_context>
chip_gen: v5e
topology: v5e:2x2
jax: 0.10.0
libtpu: 0.0.40
codegen_flags: <defaults>
</compile_context>

<pallas_src>
import functools

import jax
import jax.numpy as jnp
import numpy as np
from jax.experimental import pallas as pl
from jax.experimental.pallas import tpu as pltpu


def shift_conv_kernel(x_ref, w_ref, o_ref, *, n_segment):
    # x_ref: (R, L)  rows = flattened (batch, time) (tile aligned to clip boundaries),
    #                lanes = fused c*h*w block
    # w_ref: (3, L)  per-lane taps (channel weight repeated over h*w)
    # o_ref: (R, L)
    x = x_ref[...].astype(jnp.float32)   # f32 math even for bf16 I/O (v5e VPU has no bf16)
    w = w_ref[...].astype(jnp.float32)
    R = x.shape[0]

    w0 = w[0:1, :]
    w1 = w[1:2, :]
    w2 = w[2:3, :]

    # Per-row temporal index t = row % T; tiles always start at a clip boundary.
    t = jax.lax.broadcasted_iota(jnp.int32, (R, 1), dimension=0) % n_segment
    # Fold the zero-padding of the temporal conv into the taps: kill the x[t-1] tap at the
    # first frame and the x[t+1] tap at the last frame of every clip (also kills the
    # cross-clip / wrap-around rows brought in by the rolls below).
    w0m = jnp.where(t == 0, 0.0, w0)
    w2m = jnp.where(t == n_segment - 1, 0.0, w2)

    # Temporal neighbours via XLU sublane roll (free slot vs. VPU), no concatenate copies.
    x_prev = pltpu.roll(x, shift=1, axis=0)        # row r <- row r-1
    x_next = pltpu.roll(x, shift=R - 1, axis=0)    # row r <- row r+1

    o_ref[...] = (w0m * x_prev + (w1 * x + w2m * x_next)).astype(o_ref.dtype)


def _target_tile_bytes():
    """Per-tile byte target: bigger on v7x (~3.2 TB/s HBM makes small tiles overhead-bound)."""
    try:
        kind = jax.devices()[0].device_kind.lower()
    except Exception:
        kind = ""
    if "v7" in kind:
        return 4 * 1024 * 1024
    return 2 * 1024 * 1024


def _choose_row_block(nt, n_segment, per_row_bytes, target_bytes):
    """Largest multiple of n_segment that divides nt, keeps the tile under target_bytes, and
    respects the (8,128) sublane constraint (multiple of 8, or the full extent)."""
    n_batch = nt // n_segment
    legal = [b * n_segment for b in range(1, n_batch + 1)
             if n_batch % b == 0 and ((b * n_segment) % 8 == 0 or b * n_segment == nt)]
    if not legal:
        return nt
    best = legal[0]
    for rb in legal:
        if rb * per_row_bytes <= target_bytes:
            best = rb
        else:
            break
    return best


def _choose_lane_block(chw_pad, row_block, itemsize, target_bytes):
    """Largest multiple-of-128 divisor of chw_pad keeping a (row_block, lane_block) tile
    at or under target_bytes (halving; floor 128)."""
    lb = chw_pad
    while lb % 256 == 0 and lb * row_block * itemsize > target_bytes:
        lb //= 2
    return lb


def shift_module_forward(x, conv_weight, n_segment):
    """x: (nt, c, h, w) float32 or bfloat16; conv_weight: (c, 1, 3) (PyTorch Conv1d layout).
    Output dtype matches x.dtype; tap math is f32 inside the kernel."""
    nt, c, h, w = x.shape
    assert nt % n_segment == 0
    chw = c * h * w
    itemsize = x.dtype.itemsize

    # Free (contiguous) 2-D view -- no HBM transpose on either side of the kernel.
    x2 = x.reshape(nt, chw)

    # (c, 1, 3) -> (3, c) -> (3, c*h*w): each channel's tap repeated h*w times, matching the
    # fused c-major (c, h, w) lane ordering.  Tiny, computed once, kept in f32.
    w3 = jnp.transpose(conv_weight[:, 0, :], (1, 0)).astype(jnp.float32)
    w_tiled = jnp.repeat(w3, h * w, axis=1)

    # Harden the non-128-aligned case: pad the fused lane axis (zero taps in the pad lanes),
    # keeping lane-dense unmasked stores and bounded tiles; output is sliced back below.
    chw_pad = ((chw + 127) // 128) * 128
    if chw_pad != chw:
        x2 = jnp.pad(x2, ((0, 0), (0, chw_pad - chw)))
        w_tiled = jnp.pad(w_tiled, ((0, 0), (0, chw_pad - chw)))

    target_bytes = _target_tile_bytes()
    row_block = _choose_row_block(nt, n_segment, chw_pad * itemsize, target_bytes)
    lane_block = _choose_lane_block(chw_pad, row_block, itemsize, target_bytes)

    # Lane axis outer, row(batch) axis inner: the weight block index (0, j) is constant across
    # consecutive grid steps, so Pallas does not re-DMA the (3, lane_block) weight tile.
    grid = (chw_pad // lane_block, nt // row_block)

    # VMEM budget from the actual double-buffered tiles (in + out + weights) plus headroom.
    tile_bytes = row_block * lane_block * itemsize
    w_tile_bytes = 3 * lane_block * 4
    vmem_limit = min(max(2 * (2 * tile_bytes + w_tile_bytes) + (4 << 20), 16 << 20), 48 << 20)

    cost = pl.CostEstimate(
        flops=5 * nt * chw_pad,
        transcendentals=0,
        bytes_accessed=2 * nt * chw_pad * itemsize + 3 * chw_pad * 4,
    )

    out = pl.pallas_call(
        functools.partial(shift_conv_kernel, n_segment=n_segment),
        out_shape=jax.ShapeDtypeStruct((nt, chw_pad), x.dtype),
        grid_spec=pltpu.PrefetchScalarGridSpec(
            num_scalar_prefetch=0,
            grid=grid,
            in_specs=[
                pl.BlockSpec((row_block, lane_block), lambda j, i: (i, j)),
                pl.BlockSpec((3, lane_block), lambda j, i: (0, j)),
            ],
            out_specs=pl.BlockSpec((row_block, lane_block), lambda j, i: (i, j)),
        ),
        compiler_params=pltpu.CompilerParams(
            # Both grid axes are independent.
            # TODO(synk): on v7x, mark one axis pltpu.CORE_PARALLEL (or use core_map) and
            # verify the dual-TensorCore split in the trace; plain "parallel" may not shard.
            dimension_semantics=("parallel", "parallel"),
            vmem_limit_bytes=vmem_limit,
        ),
        cost_estimate=cost,
    )(x2, w_tiled)

    if chw_pad != chw:
        out = out[:, :chw]
    # Free reshape back to NCHW.
    return out.reshape(nt, c, h, w)


def make_shift_weight(input_channels, n_div=8):
    """Deterministic 'shift' init exactly as in ShiftModule.__init__ (mode='shift')."""
    fold = input_channels // n_div
    w = np.zeros((input_channels, 1, 3), dtype=np.float32)
    w[:fold, 0, 2] = 1.0
    w[fold:2 * fold, 0, 0] = 1.0
    if 2 * fold < input_channels:
        w[2 * fold:, 0, 1] = 1.0
    return jnp.asarray(w)


def _reference(x, conv_weight, n_segment):
    """Pure-JAX reference mirroring the PyTorch module (independent of kernel layout)."""
    nt, c, h, w = x.shape
    n_batch = nt // n_segment
    xr = x.astype(jnp.float32).reshape(n_batch, n_segment, c, h, w)
    zeros = jnp.zeros_like(xr[:, :1])
    x_prev = jnp.concatenate([zeros, xr[:, :-1]], axis=1)
    x_next = jnp.concatenate([xr[:, 1:], zeros], axis=1)
    w0 = conv_weight[:, 0, 0][None, None, :, None, None]
    w1 = conv_weight[:, 0, 1][None, None, :, None, None]
    w2 = conv_weight[:, 0, 2][None, None, :, None, None]
    out = w0 * x_prev + w1 * xr + w2 * x_next
    return out.reshape(nt, c, h, w)


if __name__ == "__main__":
    # n_segment=8, n_batch=2 -> nt=16; c=16 (n_div=8 -> fold=2, exercising all three tap
    # patterns); h=w=16 -> fused lane dim c*h*w = 4096 (128-aligned, lane-dense).
    n_segment = 8
    n_batch = 2
    nt = n_batch * n_segment
    c, h, w = 16, 16, 16

    key = jax.random.PRNGKey(0)
    x = jax.random.normal(key, (nt, c, h, w), dtype=jnp.float32)
    conv_weight = make_shift_weight(c, n_div=8)   # (c, 1, 3)

    # f32 path
    y = jax.block_until_ready(shift_module_forward(x, conv_weight, n_segment))
    y_ref = _reference(x, conv_weight, n_segment)
    assert y.shape == (nt, c, h, w)
    assert np.allclose(np.asarray(y), np.asarray(y_ref), atol=1e-5), "f32 mismatch vs reference"

    # bf16 I/O path (halves HBM traffic on a purely bandwidth-bound kernel; f32 math inside)
    x_bf16 = x.astype(jnp.bfloat16)
    y_bf16 = jax.block_until_ready(shift_module_forward(x_bf16, conv_weight, n_segment))
    assert y_bf16.dtype == jnp.bfloat16
    y_bf16_ref = _reference(x_bf16, conv_weight, n_segment)
    assert np.allclose(np.asarray(y_bf16.astype(jnp.float32)), np.asarray(y_bf16_ref),
                       atol=6e-2, rtol=5e-2), "bf16 mismatch vs reference"

    # Unaligned-lane path: h=w=6 -> c*h*w = 576 (not a multiple of 128) exercises the lane pad.
    x_u = jax.random.normal(jax.random.PRNGKey(0), (nt, c, 6, 6), dtype=jnp.float32)
    y_u = jax.block_until_ready(shift_module_forward(x_u, conv_weight, n_segment))
    y_u_ref = _reference(x_u, conv_weight, n_segment)
    assert np.allclose(np.asarray(y_u), np.asarray(y_u_ref), atol=1e-5), "padded-lane mismatch"

    print("KERNEL_OK")
</pallas_src>

<mosaic_0001>
module attributes {stable_mosaic.version = 11 : i64} {
  func.func @shift_conv_kernel(%arg0: i32, %arg1: i32, %arg2: memref<16x4096xf32, #tpu.memory_space<vmem>>, %arg3: memref<3x4096xf32, #tpu.memory_space<vmem>>, %arg4: memref<16x4096xf32, #tpu.memory_space<vmem>>) attributes {dimension_semantics = [#tpu.dimension_semantics<parallel>, #tpu.dimension_semantics<parallel>], iteration_bounds = array<i64: 1, 1>, scalar_prefetch = 0 : i64, scratch_operands = 0 : i64, tpu.core_type = #tpu.core_type<tc>, window_params = [{transform_indices = @transform_0, window_bounds = array<i64: 16, 4096>}, {transform_indices = @transform_1, window_bounds = array<i64: 3, 4096>}, {transform_indices = @transform_2, window_bounds = array<i64: 16, 4096>}]} {
    %c0 = arith.constant 0 : index
    %c0_0 = arith.constant 0 : index
    %0 = vector.load %arg2[%c0, %c0_0] : memref<16x4096xf32, #tpu.memory_space<vmem>>, vector<16x4096xf32>
    %c0_1 = arith.constant 0 : index
    %c0_2 = arith.constant 0 : index
    %1 = vector.load %arg3[%c0_1, %c0_2] : memref<3x4096xf32, #tpu.memory_space<vmem>>, vector<3x4096xf32>
    %2 = vector.extract_strided_slice %1 {offsets = [0, 0], sizes = [1, 4096], strides = [1, 1]} : vector<3x4096xf32> to vector<1x4096xf32>
    %3 = vector.extract_strided_slice %1 {offsets = [1, 0], sizes = [1, 4096], strides = [1, 1]} : vector<3x4096xf32> to vector<1x4096xf32>
    %4 = vector.extract_strided_slice %1 {offsets = [2, 0], sizes = [1, 4096], strides = [1, 1]} : vector<3x4096xf32> to vector<1x4096xf32>
    %5 = tpu.iota {dimensions = array<i32: 0>} : vector<16x1xi32>
    %c8_i32 = arith.constant 8 : i32
    %c0_i32 = arith.constant 0 : i32
    %6 = arith.cmpi eq, %c8_i32, %c0_i32 : i32
    %c1_i32 = arith.constant 1 : i32
    %7 = arith.select %6, %c1_i32, %c8_i32 : i32
    %8 = vector.broadcast %7 : i32 to vector<16x1xi32>
    %9 = arith.remsi %5, %8 : vector<16x1xi32>
    %c0_i32_3 = arith.constant 0 : i32
    %10 = vector.broadcast %c0_i32_3 : i32 to vector<16x1xi32>
    %11 = arith.cmpi ne, %9, %10 : vector<16x1xi32>
    %c0_i32_4 = arith.constant 0 : i32
    %12 = vector.broadcast %c0_i32_4 : i32 to vector<16x1xi32>
    %13 = arith.cmpi slt, %9, %12 : vector<16x1xi32>
    %c0_i32_5 = arith.constant 0 : i32
    %14 = arith.cmpi slt, %7, %c0_i32_5 : i32
    %15 = vector.broadcast %14 : i1 to vector<16x1xi1>
    %16 = vector.broadcast %15 : vector<16x1xi1> to vector<16x1xi1>
    %17 = arith.xori %13, %16 : vector<16x1xi1>
    %18 = arith.andi %17, %11 : vector<16x1xi1>
    %19 = vector.broadcast %7 : i32 to vector<16x1xi32>
    %20 = arith.addi %9, %19 : vector<16x1xi32>
    %21 = arith.select %18, %20, %9 : vector<16x1xi1>, vector<16x1xi32>
    %c0_i32_6 = arith.constant 0 : i32
    %22 = vector.broadcast %c0_i32_6 : i32 to vector<16x1xi32>
    %23 = arith.cmpi eq, %21, %22 : vector<16x1xi32>
    %cst = arith.constant 0.000000e+00 : f32
    %24 = vector.shape_cast %23 : vector<16x1xi1> to vector<16x1xi1>
    %25 = vector.broadcast %24 : vector<16x1xi1> to vector<16x4096xi1>
    %26 = vector.broadcast %cst : f32 to vector<16x4096xf32>
    %27 = vector.shape_cast %2 : vector<1x4096xf32> to vector<1x4096xf32>
    %28 = vector.broadcast %27 : vector<1x4096xf32> to vector<16x4096xf32>
    %29 = arith.select %25, %26, %28 : vector<16x4096xi1>, vector<16x4096xf32>
    %c7_i32 = arith.constant 7 : i32
    %30 = vector.broadcast %c7_i32 : i32 to vector<16x1xi32>
    %31 = arith.cmpi eq, %21, %30 : vector<16x1xi32>
    %cst_7 = arith.constant 0.000000e+00 : f32
    %32 = vector.shape_cast %31 : vector<16x1xi1> to vector<16x1xi1>
    %33 = vector.broadcast %32 : vector<16x1xi1> to vector<16x4096xi1>
    %34 = vector.broadcast %cst_7 : f32 to vector<16x4096xf32>
    %35 = vector.shape_cast %4 : vector<1x4096xf32> to vector<1x4096xf32>
    %36 = vector.broadcast %35 : vector<1x4096xf32> to vector<16x4096xf32>
    %37 = arith.select %33, %34, %36 : vector<16x4096xi1>, vector<16x4096xf32>
    %c1_i32_8 = arith.constant 1 : i32
    %38 = tpu.dynamic_rotate %0 by %c1_i32_8 dim 0 : vector<16x4096xf32>, i32 -> vector<16x4096xf32>
    %c15_i32 = arith.constant 15 : i32
    %39 = tpu.dynamic_rotate %0 by %c15_i32 dim 0 : vector<16x4096xf32>, i32 -> vector<16x4096xf32>
    %40 = arith.mulf %29, %38 : vector<16x4096xf32>
    %41 = vector.broadcast %3 : vector<1x4096xf32> to vector<16x4096xf32>
    %42 = arith.mulf %41, %0 : vector<16x4096xf32>
    %43 = arith.mulf %37, %39 : vector<16x4096xf32>
    %44 = arith.addf %42, %43 : vector<16x4096xf32>
    %45 = arith.addf %40, %44 : vector<16x4096xf32>
    %c0_9 = arith.constant 0 : index
    %c0_10 = arith.constant 0 : index
    %46 = vector.load %arg4[%c0_9, %c0_10] : memref<16x4096xf32, #tpu.memory_space<vmem>>, vector<16x4096xf32>
    tpu.vector_store %arg4[%c0_9, %c0_10], %45 {strides = array<i32>} : memref<16x4096xf32, #tpu.memory_space<vmem>>, vector<16x4096xf32>,
    return
  }
  func.func @transform_0(%arg0: i32, %arg1: i32) -> (i32, i32) {
    %c0_i32 = arith.constant 0 : i32
    return %arg1, %arg0 : i32, i32
  }
  func.func @transform_1(%arg0: i32, %arg1: i32) -> (i32, i32) {
    %c0_i32 = arith.constant 0 : i32
    %c0_i32_0 = arith.constant 0 : i32
    return %c0_i32, %arg0 : i32, i32
  }
  func.func @transform_2(%arg0: i32, %arg1: i32) -> (i32, i32) {
    %c0_i32 = arith.constant 0 : i32
    return %arg1, %arg0 : i32, i32
  }
}

</mosaic_0001>

<bundles_post_ra>
// kernel: tpu_custom_call.1
= control target key start
LH: loop header
LB: loop body
LE: loop exit
PB: predicated region body
PF: predicated region fallthrough
CT: control target
= control target key end

     0   :  { %7 = vsyncpa [#allocation3], 0  ;;  %s3171_s0 = inlined_call_operand.hbm [shape: f32[16,4096], index: 0, kind: input, shape index: {}]   ;;  %s3172_s1 = inlined_call_operand.hbm [shape: f32[3,4096], index: 1, kind: input, shape index: {}]   ;;  %s3173_s2 = inlined_call_operand.hbm [shape: f32[16,4096], index: 2, kind: output, shape index: {}]  }
   0x1   :  { %8 = vsyncpa [#allocation6], 0 }
   0x2   :  { %9 = vsyncpa [#allocation4], 0  ;;  %s14_s11 = sshll.u32 %s3171_s0, 4  ;;  %s1356_s12 = smov [#allocation2]   ;;  %s15_s11 = int_to_ptr.hbm [resolvable:$true] %s14_s11 }
   0x3   :  { %s16_s13 = sshll.u32 %s1356_s12, 4  ;;  %s28_s16 = sshll.u32 %s3172_s1, 4  ;;  %s17_s13 = int_to_ptr.vmem [resolvable:$true] %s16_s13  ;;  %s29_s16 = int_to_ptr.hbm [resolvable:$true] %s28_s16 }
   0x4   :  { %s1357_s17 = smov 4096   ;;  %s1358_s18 = smov 256  }
   0x5   :  { %22 = dma.hbm_to_vmem [thread:$0]  %s15_s11, 8192, %s17_s13, [#allocation3], %s1357_s17, %s1357_s17, %s1358_s18  }
   0x6   :  { %s1359_s19 = smov [#allocation5]  }
   0x7   :  { %s30_s20 = sshll.u32 %s1359_s19, 4  ;;  %s31_s20 = int_to_ptr.vmem [resolvable:$true] %s30_s20 }
   0x8   :  { %33 = dma.hbm_to_vmem [thread:$0]  %s29_s16, 2048, %s31_s20, [#allocation6]  }
   0x9   :  { %1350 = dma.done.wait [#allocation3], 8192  }
   0xa   :  { %1351 = vsyncadd [#allocation3], 4294959104 }
   0xb   :  { %1352 = dma.done.wait [#allocation6], 2048  }
   0xc   :  { %1353 = vsyncadd [#allocation6], 4294965248  ;;  %v122_v0 = vlaneseq  ;;  %v1390_v3 = vld [vmem:[#allocation2] sm:$0xff]  ;;  %v1416_v19 = vld [vmem:[#allocation2 + $0x8] sm:$0xff]  ;;  %s1360_s0 = smov [#allocation7]   ;;  %s1241_s23 = sshll.u32 %s3173_s2, 4  ;;  %s1242_s23 = int_to_ptr.hbm [resolvable:$true] %s1241_s23 }
   0xd   :  { %v1392_v4 = vld [vmem:[#allocation2 + $0x100] sm:$0xff]  ;;  %v3200_v10 = vrot.slane %v1390_v3, 7  ;;  %v3199_v12 = vrot.slane %v1390_v3, 1  ;;  %v1426_v23 = vld [vmem:[#allocation2 + $0x108] sm:$0xff]  ;;  %v3194_v25 = vrot.slane %v1416_v19, 7  ;;  %v3193_v37 = vrot.slane %v1416_v19, 1 }
   0xe   :  { %v1385_v1 = vshrl.u32 %v122_v0, 7  ;;  %v106_v5 = vld [vmem:[#allocation5] sm:$0x77]  ;;  %v3203_v11 = vrot.slane %v1392_v4, 7  ;;  %v3198_v13 = vrot.slane %v1392_v4, 1  ;;  %v3197_v29 = vrot.slane %v1426_v23, 7 }
   0xf   :  { %v171_v8 = vperm.slane %v106_v5, 0  ;;  %v337_v9 = vperm.slane %v106_v5, 2  ;;  %v819_v14 = vperm.slane %v106_v5, 1  ;;  %v172_v15 = vperm.slane %v106_v5, 4  ;;  %v107_v34 = vld [vmem:[#allocation5 + $0x8] sm:$0x77] }
  0x10   :  { %v129_v2 = vand.u32 7, %v1385_v1  ;;  %vm561_vm0 = vcmp.lt.s32.totalorder %v1385_v1, 1  ;;  %vm690_vm1 = vcmp.lt.s32.totalorder %v1385_v1, 7  ;;  %v338_v20 = vperm.slane %v106_v5, 6  ;;  %v1456_v42 = vld [vmem:[#allocation2 + $0x10] sm:$0xff]  ;;  %v1487_v60 = vld [vmem:[#allocation2 + $0x18] sm:$0xff] }
  0x11   :  { %v1406_v16 = vperm.slane %v171_v8, 0  ;;  %v1408_v17 = vperm.slane %v337_v9, 2  ;;  %v594_v18 = vsel %vm561_vm0, %v3203_v11, %v3200_v10  ;;  %v691_v21 = vsel %vm690_vm1, %v3199_v12, %v3198_v13  ;;  %v1458_v43 = vld [vmem:[#allocation2 + $0x110] sm:$0xff]  ;;  %v1676_v13 = vld [vmem:[#allocation2 + $0x140] sm:$0xff]  ;;  %s1239_s1 = sshll.u32 %s1360_s0, 4  ;;  %s1240_s1 = int_to_ptr.vmem [resolvable:$true] %s1239_s1 }
  0x12   :  { %vm1394_vm2 = vcmp.eq.s32.totalorder %v129_v2, 0  ;;  %vm1398_vm3 = vcmp.eq.s32.totalorder %v129_v2, 7  ;;  %v1424_v22 = vperm.slane %v819_v14, 1  ;;  %v1428_v24 = vperm.slane %v172_v15, 0  ;;  %v1498_v2 = vld [vmem:[#allocation2 + $0x118] sm:$0xff]  ;;  %3469 = vst [vmem:[#allocation15_spill] sm:$0xff] %v1676_v13 }
  0x13   :  { %v267_v26 = vsel %vm1394_vm2, 0.0, %v1406_v16  ;;  %v433_v27 = vsel %vm1398_vm3, 0.0, %v1408_v17  ;;  %v1437_v28 = vperm.slane %v338_v20, 2  ;;  %v595_v36 = vsel %vm561_vm0, %v3197_v29, %v3194_v25 }
  0x14   :  { %v755_v30 = vmul.f32 %v594_v18, %v267_v26  ;;  %v915_v31 = vmul.f32 %v1424_v22, %v1390_v3  ;;  %v979_v32 = vmul.f32 %v691_v21, %v433_v27  ;;  %v268_v33 = vsel %vm1394_vm2, 0.0, %v1428_v24  ;;  %v108_v27 = vld [vmem:[#allocation5 + $0x10] sm:$0x77] }
  0x15   :  { %v434_v35 = vsel %vm1398_vm3, 0.0, %v1437_v28  ;;  %v3190_v38 = vrot.slane %v1426_v23, 1  ;;  %v756_v40 = vmul.f32 %v595_v36, %v268_v33  ;;  %v820_v41 = vperm.slane %v106_v5, 5 }
  0x16   :  { %v1043_v39 = vadd.f32 %v979_v32, %v915_v31  ;;  %v173_v44 = vperm.slane %v107_v34, 0  ;;  %v339_v46 = vperm.slane %v107_v34, 2  ;;  %v3186_v47 = vrot.slane %v1456_v42, 7 }
  0x17   :  { %v692_v45 = vsel %vm690_vm1, %v3193_v37, %v3190_v38  ;;  %v3187_v48 = vrot.slane %v1458_v43, 7  ;;  %v1468_v50 = vperm.slane %v820_v41, 1  ;;  %v3185_v55 = vrot.slane %v1456_v42, 1 }
  0x18   :  { %v1107_v49 = vadd.f32 %v1043_v39, %v755_v30  ;;  %v980_v51 = vmul.f32 %v692_v45, %v434_v35  ;;  %v1470_v52 = vperm.slane %v173_v44, 0  ;;  %v1472_v53 = vperm.slane %v339_v46, 2 }
  0x19   :  { %v596_v54 = vsel %vm561_vm0, %v3187_v48, %v3186_v47  ;;  %v3184_v56 = vrot.slane %v1458_v43, 1  ;;  %v916_v57 = vmul.f32 %v1468_v50, %v1416_v19  ;;  %v821_v59 = vperm.slane %v107_v34, 1 }
  0x1a   :  { %1171 = vst [vmem:[#allocation7] sm:$0xff] %v1107_v49  ;;  %v269_v58 = vsel %vm1394_vm2, 0.0, %v1470_v52  ;;  %v174_v61 = vperm.slane %v107_v34, 4  ;;  %v435_v62 = vsel %vm1398_vm3, 0.0, %v1472_v53  ;;  %v340_v5 = vperm.slane %v107_v34, 6  ;;  %v1532_v49 = vld [vmem:[#allocation2 + $0x120] sm:$0xff] }
  0x1b   :  { %v693_v63 = vsel %vm690_vm1, %v3185_v55, %v3184_v56  ;;  %v757_v0 = vmul.f32 %v596_v54, %v269_v58  ;;  %v1044_v8 = vadd.f32 %v980_v51, %v916_v57  ;;  %v1500_v9 = vperm.slane %v821_v59, 1 }
  0x1c   :  { %v981_v14 = vmul.f32 %v693_v63, %v435_v62  ;;  %v1502_v15 = vperm.slane %v174_v61, 0  ;;  %v1504_v18 = vperm.slane %v340_v5, 2  ;;  %v3180_v20 = vrot.slane %v1487_v60, 7 }
  0x1d   :  { %v3183_v21 = vrot.slane %v1498_v2, 7  ;;  %v3177_v26 = vrot.slane %v1487_v60, 1  ;;  %v1108_v30 = vadd.f32 %v1044_v8, %v756_v40  ;;  %v917_v31 = vmul.f32 %v1500_v9, %v1456_v42  ;;  %v1524_v40 = vld [vmem:[#allocation2 + $0x20] sm:$0xff] }
  0x1e   :  { %v270_v32 = vsel %vm1394_vm2, 0.0, %v1502_v15  ;;  %v3174_v33 = vrot.slane %v1498_v2, 1  ;;  %v436_v35 = vsel %vm1398_vm3, 0.0, %v1504_v18  ;;  %v822_v39 = vperm.slane %v107_v34, 5 }
  0x1f   :  { %v597_v36 = vsel %vm561_vm0, %v3183_v21, %v3180_v20  ;;  %v175_v41 = vperm.slane %v108_v27, 0  ;;  %1172 = vst [vmem:[#allocation7 + $0x8] sm:$0xff] %v1108_v30  ;;  %v1045_v44 = vadd.f32 %v981_v14, %v917_v31  ;;  %v341_v51 = vperm.slane %v108_v27, 2 }
  0x20   :  { %v694_v45 = vsel %vm690_vm1, %v3177_v26, %v3174_v33  ;;  %v758_v46 = vmul.f32 %v597_v36, %v270_v32  ;;  %v1534_v54 = vperm.slane %v822_v39, 1  ;;  %v3175_v58 = vrot.slane %v1524_v40, 7  ;;  %v1558_v32 = vld [vmem:[#allocation2 + $0x28] sm:$0xff] }
  0x21   :  { %v982_v57 = vmul.f32 %v694_v45, %v436_v35  ;;  %v1536_v34 = vperm.slane %v175_v41, 0  ;;  %v1109_v59 = vadd.f32 %v1045_v44, %v757_v0  ;;  %v1539_v61 = vperm.slane %v341_v51, 2  ;;  %v1568_v51 = vld [vmem:[#allocation2 + $0x128] sm:$0xff] }
  0x22   :  { %v3176_v62 = vrot.slane %v1532_v49, 7  ;;  %v3179_v63 = vrot.slane %v1524_v40, 1  ;;  %v918_v5 = vmul.f32 %v1534_v54, %v1487_v60  ;;  %v3178_v14 = vrot.slane %v1532_v49, 1 }
  0x23   :  { %v271_v8 = vsel %vm1394_vm2, 0.0, %v1536_v34  ;;  %v823_v30 = vperm.slane %v108_v27, 1  ;;  %1173 = vst [vmem:[#allocation7 + $0x10] sm:$0xff] %v1109_v59  ;;  %v437_v0 = vsel %vm1398_vm3, 0.0, %v1539_v61  ;;  %v176_v35 = vperm.slane %v108_v27, 4 }
  0x24   :  { %v598_v31 = vsel %vm561_vm0, %v3176_v62, %v3175_v58  ;;  %v342_v36 = vperm.slane %v108_v27, 6  ;;  %v1046_v39 = vadd.f32 %v982_v57, %v918_v5  ;;  %v695_v41 = vsel %vm690_vm1, %v3179_v63, %v3178_v14  ;;  %v1575_v57 = vld [vmem:[#allocation5 + $0x18] sm:$0x77] }
  0x25   :  { %v759_v44 = vmul.f32 %v598_v31, %v271_v8  ;;  %v1566_v45 = vperm.slane %v823_v30, 1  ;;  %v983_v59 = vmul.f32 %v695_v41, %v437_v0  ;;  %v1570_v33 = vperm.slane %v176_v35, 0  ;;  %v1596_v41 = vld [vmem:[#allocation2 + $0x130] sm:$0xff] }
  0x26   :  { %v1572_v58 = vperm.slane %v342_v36, 2  ;;  %v3181_v62 = vrot.slane %v1558_v32, 7  ;;  %v1110_v5 = vadd.f32 %v1046_v39, %v758_v46  ;;  %v3182_v14 = vrot.slane %v1568_v51, 7  ;;  %v1594_v39 = vld [vmem:[#allocation2 + $0x30] sm:$0xff] }
  0x27   :  { %v919_v26 = vmul.f32 %v1566_v45, %v1524_v40  ;;  %v3189_v8 = vrot.slane %v1558_v32, 1  ;;  %v272_v30 = vsel %vm1394_vm2, 0.0, %v1570_v33  ;;  %v3188_v31 = vrot.slane %v1568_v51, 1 }
  0x28   :  { %v438_v0 = vsel %vm1398_vm3, 0.0, %v1572_v58  ;;  %v824_v35 = vperm.slane %v108_v27, 5  ;;  %1174 = vst [vmem:[#allocation7 + $0x18] sm:$0xff] %v1110_v5  ;;  %v599_v36 = vsel %vm561_vm0, %v3182_v14, %v3181_v62  ;;  %v177_v63 = vperm.slane %v1575_v57, 0 }
  0x29   :  { %v1047_v46 = vadd.f32 %v983_v59, %v919_v26  ;;  %v343_v20 = vperm.slane %v1575_v57, 2  ;;  %v696_v26 = vsel %vm690_vm1, %v3189_v8, %v3188_v31  ;;  %v760_v27 = vmul.f32 %v599_v36, %v272_v30  ;;  %v1640_v36 = vld [vmem:[#allocation2 + $0x138] sm:$0xff] }
  0x2a   :  { %v1606_v59 = vperm.slane %v824_v35, 1  ;;  %v3191_v5 = vrot.slane %v1594_v39, 7  ;;  %v984_v14 = vmul.f32 %v696_v26, %v438_v0  ;;  %v1609_v21 = vperm.slane %v177_v63, 0  ;;  %3466 = vst [vmem:[#allocation12_spill] sm:$0xff] %v1640_v36 }
  0x2b   :  { %v1111_v62 = vadd.f32 %v1047_v46, %v759_v44  ;;  %v1611_v56 = vperm.slane %v343_v20, 2  ;;  %v3192_v47 = vrot.slane %v1596_v41, 7  ;;  %v3196_v48 = vrot.slane %v1594_v39, 1  ;;  %v1638_v46 = vld [vmem:[#allocation2 + $0x38] sm:$0xff] }
  0x2c   :  { %v920_v55 = vmul.f32 %v1606_v59, %v1558_v32  ;;  %v3195_v31 = vrot.slane %v1596_v41, 1  ;;  %v273_v30 = vsel %vm1394_vm2, 0.0, %v1609_v21  ;;  %v825_v20 = vperm.slane %v1575_v57, 1  ;;  %3465 = vst [vmem:[#allocation11_spill] sm:$0xff] %v1638_v46 }
  0x2d   :  { %1175 = vst [vmem:[#allocation7 + $0x20] sm:$0xff] %v1111_v62  ;;  %v439_v63 = vsel %vm1398_vm3, 0.0, %v1611_v56  ;;  %v178_v44 = vperm.slane %v1575_v57, 4  ;;  %v600_v62 = vsel %vm561_vm0, %v3192_v47, %v3191_v5  ;;  %v3201_v37 = vrot.slane %v1638_v46, 7 }
  0x2e   :  { %v1048_v0 = vadd.f32 %v984_v14, %v920_v55  ;;  %v697_v35 = vsel %vm690_vm1, %v3196_v48, %v3195_v31  ;;  %v344_v55 = vperm.slane %v1575_v57, 6  ;;  %v761_v14 = vmul.f32 %v600_v62, %v273_v30  ;;  %v110_v31 = vld [vmem:[#allocation5 + $0x20] sm:$0x77] }
  0x2f   :  { %v1643_v26 = vperm.slane %v825_v20, 1  ;;  %v985_v8 = vmul.f32 %v697_v35, %v439_v63  ;;  %v1645_v38 = vperm.slane %v178_v44, 0  ;;  %v3202_v25 = vrot.slane %v1640_v36, 7  ;;  %v1668_v62 = vld [vmem:[#allocation2 + $0x40] sm:$0xff] }
  0x30   :  { %v1112_v5 = vadd.f32 %v1048_v0, %v760_v27  ;;  %v1647_v47 = vperm.slane %v344_v55, 2  ;;  %v3207_v20 = vrot.slane %v1638_v46, 1  ;;  %v3206_v63 = vrot.slane %v1640_v36, 1  ;;  %3468 = vst [vmem:[#allocation14_spill] sm:$0xff] %v1668_v62 }
  0x31   :  { %v921_v48 = vmul.f32 %v1643_v26, %v1594_v39  ;;  %v274_v30 = vsel %vm1394_vm2, 0.0, %v1645_v38  ;;  %v601_v44 = vsel %vm561_vm0, %v3202_v25, %v3201_v37  ;;  %v826_v0 = vperm.slane %v1575_v57, 5 }
  0x32   :  { %3467 = vst [vmem:[#allocation13_spill] sm:$0xff] %v1647_v47  ;;  %v440_v27 = vsel %vm1398_vm3, 0.0, %v1647_v47  ;;  %v179_v35 = vperm.slane %v110_v31, 0  ;;  %v762_v29 = vmul.f32 %v601_v44, %v274_v30  ;;  %v345_v12 = vperm.slane %v110_v31, 2 }
  0x33   :  { %1176 = vst [vmem:[#allocation7 + $0x28] sm:$0xff] %v1112_v5  ;;  %v1049_v55 = vadd.f32 %v985_v8, %v921_v48  ;;  %v698_v5 = vsel %vm690_vm1, %v3207_v20, %v3206_v63  ;;  %v1678_v10 = vperm.slane %v826_v0, 1  ;;  %v3213_v57 = vrot.slane %v1668_v62, 7 }
  0x34   :  { %v986_v37 = vmul.f32 %v698_v5, %v440_v27  ;;  %v1680_v25 = vperm.slane %v179_v35, 0  ;;  %v1683_v48 = vperm.slane %v345_v12, 2  ;;  %v3214_v8 = vrot.slane %v1676_v13, 7  ;;  %v1702_v35 = vld [vmem:[#allocation2 + $0x48] sm:$0xff] }
  0x35   :  { %3470 = vst [vmem:[#allocation16_spill] sm:$0xff] %v1678_v10  ;;  %v1113_v11 = vadd.f32 %v1049_v55, %v761_v14  ;;  %v3218_v36 = vrot.slane %v1668_v62, 1  ;;  %v922_v30 = vmul.f32 %v1678_v10, %v1638_v46  ;;  %v3217_v27 = vrot.slane %v1676_v13, 1 }
  0x36   :  { %3471 = vst [vmem:[#allocation17_spill] sm:$0xff] %v1680_v25  ;;  %v275_v44 = vsel %vm1394_vm2, 0.0, %v1680_v25  ;;  %v827_v0 = vperm.slane %v110_v31, 1  ;;  %v441_v12 = vsel %vm1398_vm3, 0.0, %v1683_v48  ;;  %v602_v14 = vsel %vm561_vm0, %v3214_v8, %v3213_v57  ;;  %v1712_v25 = vld [vmem:[#allocation2 + $0x148] sm:$0xff] }
  0x37   :  { %3472 = vst [vmem:[#allocation18_spill] sm:$0xff] %v1683_v48  ;;  %v180_v55 = vperm.slane %v110_v31, 4  ;;  %v346_v5 = vperm.slane %v110_v31, 6  ;;  %v1050_v63 = vadd.f32 %v986_v37, %v922_v30  ;;  %v763_v20 = vmul.f32 %v602_v14, %v275_v44  ;;  %v1719_v37 = vld [vmem:[#allocation5 + $0x28] sm:$0x77] }
  0x38   :  { %1177 = vst [vmem:[#allocation7 + $0x30] sm:$0xff] %v1113_v11  ;;  %v699_v11 = vsel %vm690_vm1, %v3218_v36, %v3217_v27  ;;  %v1710_v48 = vperm.slane %v827_v0, 1  ;;  %v3219_v8 = vrot.slane %v1702_v35, 7  ;;  %v3220_v27 = vrot.slane %v1712_v25, 7 }
  0x39   :  { %3473 = vst [vmem:[#allocation19_spill] sm:$0xff] %v1702_v35  ;;  %v987_v10 = vmul.f32 %v699_v11, %v441_v12  ;;  %v1714_v46 = vperm.slane %v180_v55, 0  ;;  %v1716_v57 = vperm.slane %v346_v5, 2  ;;  %v1114_v30 = vadd.f32 %v1050_v63, %v762_v29  ;;  %v1738_v5 = vld [vmem:[#allocation2 + $0x50] sm:$0xff] }
  0x3a   :  { %3474 = vst [vmem:[#allocation20_spill] sm:$0xff] %v1710_v48  ;;  %v923_v13 = vmul.f32 %v1710_v48, %v1668_v62  ;;  %v3229_v14 = vrot.slane %v1712_v25, 1  ;;  %v828_v55 = vperm.slane %v110_v31, 5  ;;  %v603_v63 = vsel %vm561_vm0, %v3220_v27, %v3219_v8  ;;  %v1740_v11 = vld [vmem:[#allocation2 + $0x150] sm:$0xff] }
  0x3b   :  { %3475 = vst [vmem:[#allocation21_spill] sm:$0xff] %v1712_v25  ;;  %v276_v0 = vsel %vm1394_vm2, 0.0, %v1714_v46  ;;  %v442_v12 = vsel %vm1398_vm3, 0.0, %v1716_v57  ;;  %v181_v36 = vperm.slane %v1719_v37, 0  ;;  %v347_v44 = vperm.slane %v1719_v37, 2 }
  0x3c   :  { %3476 = vst [vmem:[#allocation22_spill] sm:$0xff] %v1714_v46  ;;  %v1051_v29 = vadd.f32 %v987_v10, %v923_v13  ;;  %v3480_v31 = vrot.slane %v1702_v35, 1  ;;  %v764_v13 = vmul.f32 %v603_v63, %v276_v0  ;;  %v3231_v8 = vrot.slane %v1738_v5, 7  ;;  %v1784_v63 = vld [vmem:[#allocation2 + $0x158] sm:$0xff] }
  0x3d   :  { %3477 = vst [vmem:[#allocation23_spill] sm:$0xff] %v1716_v57  ;;  %v1753_v46 = vperm.slane %v181_v36, 0  ;;  %v1755_v48 = vperm.slane %v347_v44, 2  ;;  %v3232_v25 = vrot.slane %v1740_v11, 7  ;;  %v3237_v47 = vrot.slane %v1738_v5, 1 }
  0x3e   :  { %1178 = vst [vmem:[#allocation7 + $0x38] sm:$0xff] %v1114_v30  ;;  %v700_v10 = vsel %vm690_vm1, %v3480_v31, %v3229_v14  ;;  %v1750_v30 = vperm.slane %v828_v55, 1  ;;  %v1115_v27 = vadd.f32 %v1051_v29, %v763_v20  ;;  %v3236_v31 = vrot.slane %v1740_v11, 1  ;;  %v1782_v29 = vld [vmem:[#allocation2 + $0x58] sm:$0xff] }
  0x3f   :  { %3478 = vst [vmem:[#allocation24_spill] sm:$0xff] %v1738_v5  ;;  %v988_v57 = vmul.f32 %v700_v10, %v442_v12  ;;  %v277_v0 = vsel %vm1394_vm2, 0.0, %v1753_v46  ;;  %v443_v36 = vsel %vm1398_vm3, 0.0, %v1755_v48  ;;  %v829_v20 = vperm.slane %v1719_v37, 1 }
  0x40   :  { %3479 = vst [vmem:[#allocation25_spill] sm:$0xff] %v1740_v11  ;;  %v924_v62 = vmul.f32 %v1750_v30, %v1702_v35  ;;  %v182_v44 = vperm.slane %v1719_v37, 4  ;;  %v701_v55 = vsel %vm690_vm1, %v3237_v47, %v3236_v31  ;;  %v3243_v11 = vrot.slane %v1782_v29, 7  ;;  %v112_v31 = vld [vmem:[#allocation5 + $0x30] sm:$0x77] }
  0x41   :  { %3481 = vst [vmem:[#allocation26_spill] sm:$0xff] %v1750_v30  ;;  %v1787_v10 = vperm.slane %v829_v20, 1  ;;  %v989_v14 = vmul.f32 %v701_v55, %v443_v36  ;;  %v3249_v20 = vrot.slane %v1782_v29, 1  ;;  %v3248_v36 = vrot.slane %v1784_v63, 1 }
  0x42   :  { %3482 = vst [vmem:[#allocation27_spill] sm:$0xff] %v1753_v46  ;;  %v1052_v12 = vadd.f32 %v988_v57, %v924_v62  ;;  %v348_v62 = vperm.slane %v1719_v37, 6  ;;  %v3244_v46 = vrot.slane %v1784_v63, 7  ;;  %v183_v55 = vperm.slane %v112_v31, 0 }
  0x43   :  { %3483 = vst [vmem:[#allocation28_spill] sm:$0xff] %v1755_v48  ;;  %v1789_v48 = vperm.slane %v182_v44, 0  ;;  %v925_v47 = vmul.f32 %v1787_v10, %v1738_v5  ;;  %v124_v6 = vadd.s32 8, %v1385_v1 }
  0x44   :  { %1179 = vst [vmem:[#allocation7 + $0x40] sm:$0xff] %v1115_v27  ;;  %v604_v27 = vsel %vm561_vm0, %v3232_v25, %v3231_v8  ;;  %v1116_v8 = vadd.f32 %v1052_v12, %v764_v13  ;;  %v1791_v25 = vperm.slane %v348_v62, 2  ;;  %v605_v44 = vsel %vm561_vm0, %v3244_v46, %v3243_v11 }
  0x45   :  { %3484 = vst [vmem:[#allocation29_spill] sm:$0xff] %v1782_v29  ;;  %v765_v57 = vmul.f32 %v604_v27, %v277_v0  ;;  %v278_v0 = vsel %vm1394_vm2, 0.0, %v1789_v48  ;;  %v830_v12 = vperm.slane %v1719_v37, 5  ;;  %v1812_v27 = vld [vmem:[#allocation2 + $0x60] sm:$0xff]  ;;  %v1053_v62 = vadd.f32 %v989_v14, %v925_v47 }
  0x46   :  { %3485 = vst [vmem:[#allocation30_spill] sm:$0xff] %v1784_v63  ;;  %v444_v13 = vsel %vm1398_vm3, 0.0, %v1791_v25  ;;  %v1824_v46 = vperm.slane %v183_v55, 0  ;;  %v3255_v37 = vrot.slane %v1812_v27, 7  ;;  %v3260_v63 = vrot.slane %v1812_v27, 1  ;;  %v1846_v55 = vld [vmem:[#allocation2 + $0x68] sm:$0xff] }
  0x47   :  { %3486 = vst [vmem:[#allocation31_spill] sm:$0xff] %v1787_v10  ;;  %v349_v10 = vperm.slane %v112_v31, 2  ;;  %v1822_v5 = vperm.slane %v830_v12, 1  ;;  %v1117_v30 = vadd.f32 %v1053_v62, %v765_v57  ;;  %v831_v12 = vperm.slane %v112_v31, 1 }
  0x48   :  { %3487 = vst [vmem:[#allocation32_spill] sm:$0xff] %v1789_v48  ;;  %v1820_v48 = vld [vmem:[#allocation2 + $0x160] sm:$0xff]  ;;  %v184_v62 = vperm.slane %v112_v31, 4 }
  0x49   :  { %3488 = vst [vmem:[#allocation33_spill] sm:$0xff] %v1791_v25  ;;  %v766_v25 = vmul.f32 %v605_v44, %v278_v0  ;;  %v1827_v47 = vperm.slane %v349_v10, 2  ;;  %v3256_v14 = vrot.slane %v1820_v48, 7  ;;  %v926_v0 = vmul.f32 %v1822_v5, %v1782_v29 }
  0x4a   :  { %1180 = vst [vmem:[#allocation7 + $0x48] sm:$0xff] %v1116_v8  ;;  %v702_v8 = vsel %vm690_vm1, %v3249_v20, %v3248_v36  ;;  %v279_v44 = vsel %vm1394_vm2, 0.0, %v1824_v46  ;;  %v1858_v29 = vperm.slane %v184_v62, 0  ;;  %v832_v62 = vperm.slane %v112_v31, 5 }
  0x4b   :  { %3489 = vst [vmem:[#allocation34_spill] sm:$0xff] %v1812_v27  ;;  %v990_v11 = vmul.f32 %v702_v8, %v444_v13  ;;  %v3259_v13 = vrot.slane %v1820_v48, 1  ;;  %v445_v57 = vsel %vm1398_vm3, 0.0, %v1827_v47  ;;  %v606_v10 = vsel %vm561_vm0, %v3256_v14, %v3255_v37 }
  0x4c   :  { %3490 = vst [vmem:[#allocation35_spill] sm:$0xff] %v1820_v48  ;;  %v350_v8 = vperm.slane %v112_v31, 6  ;;  %v767_v20 = vmul.f32 %v606_v10, %v279_v44  ;;  %v3261_v14 = vrot.slane %v1846_v55, 7  ;;  %v3501_v31 = vrot.slane %v1846_v55, 1 }
  0x4d   :  { %3491 = vst [vmem:[#allocation36_spill] sm:$0xff] %v1822_v5  ;;  %v1054_v36 = vadd.f32 %v990_v11, %v926_v0  ;;  %v1863_v11 = vld [vmem:[#allocation5 + $0x38] sm:$0x77] }
  0x4e   :  { %3492 = vst [vmem:[#allocation37_spill] sm:$0xff] %v1824_v46  ;;  %v1856_v46 = vld [vmem:[#allocation2 + $0x168] sm:$0xff]  ;;  %v1860_v37 = vperm.slane %v350_v8, 2  ;;  %v1882_v8 = vld [vmem:[#allocation2 + $0x70] sm:$0xff]  ;;  %v351_v44 = vperm.slane %v1863_v11, 2 }
  0x4f   :  { %3493 = vst [vmem:[#allocation38_spill] sm:$0xff] %v1827_v47  ;;  %v1854_v47 = vperm.slane %v831_v12, 1  ;;  %v1118_v0 = vadd.f32 %v1054_v36, %v766_v25  ;;  %v280_v12 = vsel %vm1394_vm2, 0.0, %v1858_v29  ;;  %v3272_v10 = vrot.slane %v1856_v46, 1 }
  0x50   :  { %1181 = vst [vmem:[#allocation7 + $0x50] sm:$0xff] %v1117_v30  ;;  %v703_v30 = vsel %vm690_vm1, %v3260_v63, %v3259_v13  ;;  %v3262_v13 = vrot.slane %v1856_v46, 7  ;;  %v185_v63 = vperm.slane %v1863_v11, 0  ;;  %v3280_v35 = vrot.slane %v1882_v8, 1 }
  0x51   :  { %3494 = vst [vmem:[#allocation39_spill] sm:$0xff] %v1846_v55  ;;  %v991_v5 = vmul.f32 %v703_v30, %v445_v57  ;;  %v927_v48 = vmul.f32 %v1854_v47, %v1812_v27  ;;  %v446_v57 = vsel %vm1398_vm3, 0.0, %v1860_v37  ;;  %v1884_v30 = vld [vmem:[#allocation2 + $0x170] sm:$0xff] }
  0x52   :  { %3495 = vst [vmem:[#allocation40_spill] sm:$0xff] %v1854_v47  ;;  %v607_v36 = vsel %vm561_vm0, %v3262_v13, %v3261_v14  ;;  %v3274_v14 = vrot.slane %v1882_v8, 7  ;;  %v1899_v47 = vperm.slane %v351_v44, 2  ;;  %v186_v44 = vperm.slane %v1863_v11, 4 }
  0x53   :  { %3496 = vst [vmem:[#allocation41_spill] sm:$0xff] %v1856_v46  ;;  %v1055_v25 = vadd.f32 %v991_v5, %v927_v48  ;;  %v704_v48 = vsel %vm690_vm1, %v3501_v31, %v3272_v10  ;;  %v768_v5 = vmul.f32 %v607_v36, %v280_v12  ;;  %v3275_v46 = vrot.slane %v1884_v30, 7  ;;  %v1928_v36 = vld [vmem:[#allocation2 + $0x178] sm:$0xff] }
  0x54   :  { %3497 = vst [vmem:[#allocation42_spill] sm:$0xff] %v1858_v29  ;;  %v1897_v29 = vperm.slane %v185_v63, 0  ;;  %v3279_v31 = vrot.slane %v1884_v30, 1  ;;  %v447_v63 = vsel %vm1398_vm3, 0.0, %v1899_v47 }
  0x55   :  { %3498 = vst [vmem:[#allocation43_spill] sm:$0xff] %v1860_v37  ;;  %v1119_v13 = vadd.f32 %v1055_v25, %v767_v20  ;;  %v992_v37 = vmul.f32 %v704_v48, %v446_v57  ;;  %v833_v20 = vperm.slane %v1863_v11, 1  ;;  %v1926_v25 = vld [vmem:[#allocation2 + $0x78] sm:$0xff] }
  0x56   :  { %1182 = vst [vmem:[#allocation7 + $0x58] sm:$0xff] %v1118_v0  ;;  %v1894_v0 = vperm.slane %v832_v62, 1  ;;  %v281_v12 = vsel %vm1394_vm2, 0.0, %v1897_v29  ;;  %v705_v62 = vsel %vm690_vm1, %v3280_v35, %v3279_v31  ;;  %v114_v31 = vld [vmem:[#allocation5 + $0x40] sm:$0x77] }
  0x57   :  { %3499 = vst [vmem:[#allocation44_spill] sm:$0xff] %v1882_v8  ;;  %v1931_v48 = vperm.slane %v833_v20, 1  ;;  %v993_v10 = vmul.f32 %v705_v62, %v447_v63  ;;  %v3292_v20 = vrot.slane %v1926_v25, 1  ;;  %v3291_v63 = vrot.slane %v1928_v36, 1 }
  0x58   :  { %3500 = vst [vmem:[#allocation45_spill] sm:$0xff] %v1884_v30  ;;  %v928_v27 = vmul.f32 %v1894_v0, %v1846_v55  ;;  %v3286_v30 = vrot.slane %v1926_v25, 7  ;;  %v187_v62 = vperm.slane %v114_v31, 0 }
  0x59   :  { %3502 = vst [vmem:[#allocation46_spill] sm:$0xff] %v1894_v0  ;;  %v929_v35 = vmul.f32 %v1931_v48, %v1882_v8 }
  0x5a   :  { %3503 = vst [vmem:[#allocation47_spill] sm:$0xff] %v1897_v29  ;;  %v1056_v57 = vadd.f32 %v992_v37, %v928_v27  ;;  %v352_v27 = vperm.slane %v1863_v11, 6  ;;  %v3287_v29 = vrot.slane %v1928_v36, 7 }
  0x5b   :  { %3504 = vst [vmem:[#allocation48_spill] sm:$0xff] %v1899_v47  ;;  %v1933_v47 = vperm.slane %v186_v44, 0 }
  0x5c   :  { %1183 = vst [vmem:[#allocation7 + $0x60] sm:$0xff] %v1119_v13  ;;  %v608_v13 = vsel %vm561_vm0, %v3275_v46, %v3274_v14  ;;  %v1120_v14 = vadd.f32 %v1056_v57, %v768_v5  ;;  %v1935_v46 = vperm.slane %v352_v27, 2  ;;  %v609_v44 = vsel %vm561_vm0, %v3287_v29, %v3286_v30 }
  0x5d   :  { %3505 = vst [vmem:[#allocation49_spill] sm:$0xff] %v1926_v25  ;;  %v769_v37 = vmul.f32 %v608_v13, %v281_v12  ;;  %v282_v12 = vsel %vm1394_vm2, 0.0, %v1933_v47  ;;  %v834_v57 = vperm.slane %v1863_v11, 5  ;;  %v1956_v13 = vld [vmem:[#allocation2 + $0x80] sm:$0xff]  ;;  %v1057_v27 = vadd.f32 %v993_v10, %v929_v35 }
  0x5e   :  { %3506 = vst [vmem:[#allocation50_spill] sm:$0xff] %v1928_v36  ;;  %v448_v5 = vsel %vm1398_vm3, 0.0, %v1935_v46  ;;  %v1968_v29 = vperm.slane %v187_v62, 0  ;;  %v3298_v11 = vrot.slane %v1956_v13, 7  ;;  %v3303_v36 = vrot.slane %v1956_v13, 1  ;;  %v1990_v62 = vld [vmem:[#allocation2 + $0x88] sm:$0xff] }
  0x5f   :  { %3507 = vst [vmem:[#allocation51_spill] sm:$0xff] %v1931_v48  ;;  %v353_v48 = vperm.slane %v114_v31, 2  ;;  %v1966_v8 = vperm.slane %v834_v57, 1  ;;  %v1121_v0 = vadd.f32 %v1057_v27, %v769_v37  ;;  %v835_v57 = vperm.slane %v114_v31, 1 }
  0x60   :  { %3508 = vst [vmem:[#allocation52_spill] sm:$0xff] %v1933_v47  ;;  %v1964_v47 = vld [vmem:[#allocation2 + $0x180] sm:$0xff]  ;;  %v188_v27 = vperm.slane %v114_v31, 4 }
  0x61   :  { %3509 = vst [vmem:[#allocation53_spill] sm:$0xff] %v1935_v46  ;;  %v770_v46 = vmul.f32 %v609_v44, %v282_v12  ;;  %v1971_v35 = vperm.slane %v353_v48, 2  ;;  %v3299_v10 = vrot.slane %v1964_v47, 7  ;;  %v930_v12 = vmul.f32 %v1966_v8, %v1926_v25 }
  0x62   :  { %1184 = vst [vmem:[#allocation7 + $0x68] sm:$0xff] %v1120_v14  ;;  %v706_v14 = vsel %vm690_vm1, %v3292_v20, %v3291_v63  ;;  %v283_v44 = vsel %vm1394_vm2, 0.0, %v1968_v29  ;;  %v2002_v25 = vperm.slane %v188_v27, 0  ;;  %v836_v27 = vperm.slane %v114_v31, 5 }
  0x63   :  { %3510 = vst [vmem:[#allocation54_spill] sm:$0xff] %v1956_v13  ;;  %v994_v30 = vmul.f32 %v706_v14, %v448_v5  ;;  %v3302_v5 = vrot.slane %v1964_v47, 1  ;;  %v449_v37 = vsel %vm1398_vm3, 0.0, %v1971_v35  ;;  %v610_v48 = vsel %vm561_vm0, %v3299_v10, %v3298_v11 }
  0x64   :  { %3511 = vst [vmem:[#allocation55_spill] sm:$0xff] %v1964_v47  ;;  %v354_v14 = vperm.slane %v114_v31, 6  ;;  %v771_v20 = vmul.f32 %v610_v48, %v283_v44  ;;  %v3304_v10 = vrot.slane %v1990_v62, 7  ;;  %v3522_v31 = vrot.slane %v1990_v62, 1 }
  0x65   :  { %3512 = vst [vmem:[#allocation56_spill] sm:$0xff] %v1966_v8  ;;  %v1058_v63 = vadd.f32 %v994_v30, %v930_v12  ;;  %v2007_v30 = vld [vmem:[#allocation5 + $0x48] sm:$0x77] }
  0x66   :  { %3513 = vst [vmem:[#allocation57_spill] sm:$0xff] %v1968_v29  ;;  %v2000_v29 = vld [vmem:[#allocation2 + $0x188] sm:$0xff]  ;;  %v2004_v11 = vperm.slane %v354_v14, 2  ;;  %v2026_v14 = vld [vmem:[#allocation2 + $0x90] sm:$0xff]  ;;  %v355_v44 = vperm.slane %v2007_v30, 2 }
  0x67   :  { %3514 = vst [vmem:[#allocation58_spill] sm:$0xff] %v1971_v35  ;;  %v1998_v35 = vperm.slane %v835_v57, 1  ;;  %v1122_v12 = vadd.f32 %v1058_v63, %v770_v46  ;;  %v284_v57 = vsel %vm1394_vm2, 0.0, %v2002_v25  ;;  %v3315_v48 = vrot.slane %v2000_v29, 1 }
  0x68   :  { %1185 = vst [vmem:[#allocation7 + $0x70] sm:$0xff] %v1121_v0  ;;  %v707_v0 = vsel %vm690_vm1, %v3303_v36, %v3302_v5  ;;  %v3305_v5 = vrot.slane %v2000_v29, 7  ;;  %v189_v36 = vperm.slane %v2007_v30, 0  ;;  %v3323_v55 = vrot.slane %v2026_v14, 1 }
  0x69   :  { %3515 = vst [vmem:[#allocation59_spill] sm:$0xff] %v1990_v62  ;;  %v995_v8 = vmul.f32 %v707_v0, %v449_v37  ;;  %v931_v47 = vmul.f32 %v1998_v35, %v1956_v13  ;;  %v450_v37 = vsel %vm1398_vm3, 0.0, %v2004_v11  ;;  %v2028_v0 = vld [vmem:[#allocation2 + $0x190] sm:$0xff] }
  0x6a   :  { %3516 = vst [vmem:[#allocation60_spill] sm:$0xff] %v1998_v35  ;;  %v611_v63 = vsel %vm561_vm0, %v3305_v5, %v3304_v10  ;;  %v3317_v10 = vrot.slane %v2026_v14, 7  ;;  %v2043_v35 = vperm.slane %v355_v44, 2  ;;  %v190_v44 = vperm.slane %v2007_v30, 4 }
  0x6b   :  { %3517 = vst [vmem:[#allocation61_spill] sm:$0xff] %v2000_v29  ;;  %v1059_v46 = vadd.f32 %v995_v8, %v931_v47  ;;  %v708_v47 = vsel %vm690_vm1, %v3522_v31, %v3315_v48  ;;  %v772_v8 = vmul.f32 %v611_v63, %v284_v57  ;;  %v3318_v29 = vrot.slane %v2028_v0, 7  ;;  %v2072_v63 = vld [vmem:[#allocation2 + $0x198] sm:$0xff] }
  0x6c   :  { %3518 = vst [vmem:[#allocation62_spill] sm:$0xff] %v2002_v25  ;;  %v2041_v25 = vperm.slane %v189_v36, 0  ;;  %v3322_v31 = vrot.slane %v2028_v0, 1  ;;  %v451_v36 = vsel %vm1398_vm3, 0.0, %v2043_v35 }
  0x6d   :  { %3519 = vst [vmem:[#allocation63_spill] sm:$0xff] %v2004_v11  ;;  %v1123_v5 = vadd.f32 %v1059_v46, %v771_v20  ;;  %v996_v11 = vmul.f32 %v708_v47, %v450_v37  ;;  %v837_v20 = vperm.slane %v2007_v30, 1  ;;  %v2070_v46 = vld [vmem:[#allocation2 + $0x98] sm:$0xff] }
  0x6e   :  { %1186 = vst [vmem:[#allocation7 + $0x78] sm:$0xff] %v1122_v12  ;;  %v2038_v12 = vperm.slane %v836_v27, 1  ;;  %v285_v57 = vsel %vm1394_vm2, 0.0, %v2041_v25  ;;  %v709_v27 = vsel %vm690_vm1, %v3323_v55, %v3322_v31  ;;  %v116_v31 = vld [vmem:[#allocation5 + $0x50] sm:$0x77] }
  0x6f   :  { %3520 = vst [vmem:[#allocation64_spill] sm:$0xff] %v2026_v14  ;;  %v2075_v47 = vperm.slane %v837_v20, 1  ;;  %v997_v48 = vmul.f32 %v709_v27, %v451_v36  ;;  %v3335_v20 = vrot.slane %v2070_v46, 1  ;;  %v3334_v36 = vrot.slane %v2072_v63, 1 }
  0x70   :  { %3521 = vst [vmem:[#allocation65_spill] sm:$0xff] %v2028_v0  ;;  %v932_v13 = vmul.f32 %v2038_v12, %v1990_v62  ;;  %v3329_v0 = vrot.slane %v2070_v46, 7  ;;  %v191_v27 = vperm.slane %v116_v31, 0 }
  0x71   :  { %3523 = vst [vmem:[#allocation66_spill] sm:$0xff] %v2038_v12  ;;  %v933_v55 = vmul.f32 %v2075_v47, %v2026_v14 }
  0x72   :  { %3524 = vst [vmem:[#allocation67_spill] sm:$0xff] %v2041_v25  ;;  %v1060_v37 = vadd.f32 %v996_v11, %v932_v13  ;;  %v356_v13 = vperm.slane %v2007_v30, 6  ;;  %v3330_v25 = vrot.slane %v2072_v63, 7 }
  0x73   :  { %3525 = vst [vmem:[#allocation68_spill] sm:$0xff] %v2043_v35  ;;  %v2077_v35 = vperm.slane %v190_v44, 0 }
  0x74   :  { %1187 = vst [vmem:[#allocation7 + $0x80] sm:$0xff] %v1123_v5  ;;  %v612_v5 = vsel %vm561_vm0, %v3318_v29, %v3317_v10  ;;  %v1124_v10 = vadd.f32 %v1060_v37, %v772_v8  ;;  %v2079_v29 = vperm.slane %v356_v13, 2  ;;  %v613_v44 = vsel %vm561_vm0, %v3330_v25, %v3329_v0 }
  0x75   :  { %3526 = vst [vmem:[#allocation69_spill] sm:$0xff] %v2070_v46  ;;  %v773_v11 = vmul.f32 %v612_v5, %v285_v57  ;;  %v286_v57 = vsel %vm1394_vm2, 0.0, %v2077_v35  ;;  %v838_v37 = vperm.slane %v2007_v30, 5  ;;  %v2100_v5 = vld [vmem:[#allocation2 + $0xa0] sm:$0xff]  ;;  %v1061_v13 = vadd.f32 %v997_v48, %v933_v55 }
  0x76   :  { %3527 = vst [vmem:[#allocation70_spill] sm:$0xff] %v2072_v63  ;;  %v452_v8 = vsel %vm1398_vm3, 0.0, %v2079_v29  ;;  %v2112_v25 = vperm.slane %v191_v27, 0  ;;  %v3341_v30 = vrot.slane %v2100_v5, 7  ;;  %v3346_v63 = vrot.slane %v2100_v5, 1  ;;  %v2134_v27 = vld [vmem:[#allocation2 + $0xa8] sm:$0xff] }
  0x77   :  { %3528 = vst [vmem:[#allocation71_spill] sm:$0xff] %v2075_v47  ;;  %v357_v47 = vperm.slane %v116_v31, 2  ;;  %v2110_v14 = vperm.slane %v838_v37, 1  ;;  %v1125_v12 = vadd.f32 %v1061_v13, %v773_v11  ;;  %v839_v37 = vperm.slane %v116_v31, 1 }
  0x78   :  { %3529 = vst [vmem:[#allocation72_spill] sm:$0xff] %v2077_v35  ;;  %v2108_v35 = vld [vmem:[#allocation2 + $0x1a0] sm:$0xff]  ;;  %v192_v13 = vperm.slane %v116_v31, 4 }
  0x79   :  { %3530 = vst [vmem:[#allocation73_spill] sm:$0xff] %v2079_v29  ;;  %v774_v29 = vmul.f32 %v613_v44, %v286_v57  ;;  %v2115_v55 = vperm.slane %v357_v47, 2  ;;  %v3342_v48 = vrot.slane %v2108_v35, 7  ;;  %v934_v57 = vmul.f32 %v2110_v14, %v2070_v46 }
  0x7a   :  { %1188 = vst [vmem:[#allocation7 + $0x88] sm:$0xff] %v1124_v10  ;;  %v710_v10 = vsel %vm690_vm1, %v3335_v20, %v3334_v36  ;;  %v287_v44 = vsel %vm1394_vm2, 0.0, %v2112_v25  ;;  %v2146_v46 = vperm.slane %v192_v13, 0  ;;  %v840_v13 = vperm.slane %v116_v31, 5 }
  0x7b   :  { %3531 = vst [vmem:[#allocation74_spill] sm:$0xff] %v2100_v5  ;;  %v998_v0 = vmul.f32 %v710_v10, %v452_v8  ;;  %v3345_v8 = vrot.slane %v2108_v35, 1  ;;  %v453_v11 = vsel %vm1398_vm3, 0.0, %v2115_v55  ;;  %v614_v47 = vsel %vm561_vm0, %v3342_v48, %v3341_v30 }
  0x7c   :  { %3532 = vst [vmem:[#allocation75_spill] sm:$0xff] %v2108_v35  ;;  %v358_v10 = vperm.slane %v116_v31, 6  ;;  %v775_v20 = vmul.f32 %v614_v47, %v287_v44  ;;  %v3347_v48 = vrot.slane %v2134_v27, 7  ;;  %v3543_v31 = vrot.slane %v2134_v27, 1 }
  0x7d   :  { %3533 = vst [vmem:[#allocation76_spill] sm:$0xff] %v2110_v14  ;;  %v1062_v36 = vadd.f32 %v998_v0, %v934_v57  ;;  %v2151_v0 = vld [vmem:[#allocation5 + $0x58] sm:$0x77] }
  0x7e   :  { %3534 = vst [vmem:[#allocation77_spill] sm:$0xff] %v2112_v25  ;;  %v2144_v25 = vld [vmem:[#allocation2 + $0x1a8] sm:$0xff]  ;;  %v2148_v30 = vperm.slane %v358_v10, 2  ;;  %v2170_v10 = vld [vmem:[#allocation2 + $0xb0] sm:$0xff]  ;;  %v359_v44 = vperm.slane %v2151_v0, 2 }
  0x7f   :  { %3535 = vst [vmem:[#allocation78_spill] sm:$0xff] %v2115_v55  ;;  %v2142_v55 = vperm.slane %v839_v37, 1  ;;  %v1126_v57 = vadd.f32 %v1062_v36, %v774_v29  ;;  %v288_v37 = vsel %vm1394_vm2, 0.0, %v2146_v46  ;;  %v3358_v47 = vrot.slane %v2144_v25, 1 }
  0x80   :  { %1189 = vst [vmem:[#allocation7 + $0x90] sm:$0xff] %v1125_v12  ;;  %v711_v12 = vsel %vm690_vm1, %v3346_v63, %v3345_v8  ;;  %v3348_v8 = vrot.slane %v2144_v25, 7  ;;  %v193_v63 = vperm.slane %v2151_v0, 0  ;;  %v3366_v62 = vrot.slane %v2170_v10, 1 }
  0x81   :  { %3536 = vst [vmem:[#allocation79_spill] sm:$0xff] %v2134_v27  ;;  %v999_v14 = vmul.f32 %v711_v12, %v453_v11  ;;  %v935_v35 = vmul.f32 %v2142_v55, %v2100_v5  ;;  %v454_v11 = vsel %vm1398_vm3, 0.0, %v2148_v30  ;;  %v2172_v12 = vld [vmem:[#allocation2 + $0x1b0] sm:$0xff] }
  0x82   :  { %3537 = vst [vmem:[#allocation80_spill] sm:$0xff] %v2142_v55  ;;  %v615_v36 = vsel %vm561_vm0, %v3348_v8, %v3347_v48  ;;  %v3360_v48 = vrot.slane %v2170_v10, 7  ;;  %v2187_v55 = vperm.slane %v359_v44, 2  ;;  %v194_v44 = vperm.slane %v2151_v0, 4 }
  0x83   :  { %3538 = vst [vmem:[#allocation81_spill] sm:$0xff] %v2144_v25  ;;  %v1063_v29 = vadd.f32 %v999_v14, %v935_v35  ;;  %v712_v35 = vsel %vm690_vm1, %v3543_v31, %v3358_v47  ;;  %v776_v14 = vmul.f32 %v615_v36, %v288_v37  ;;  %v3361_v25 = vrot.slane %v2172_v12, 7  ;;  %v2216_v36 = vld [vmem:[#allocation2 + $0x1b8] sm:$0xff] }
  0x84   :  { %3539 = vst [vmem:[#allocation82_spill] sm:$0xff] %v2146_v46  ;;  %v2185_v46 = vperm.slane %v193_v63, 0  ;;  %v3365_v31 = vrot.slane %v2172_v12, 1  ;;  %v455_v63 = vsel %vm1398_vm3, 0.0, %v2187_v55 }
  0x85   :  { %3540 = vst [vmem:[#allocation83_spill] sm:$0xff] %v2148_v30  ;;  %v1127_v8 = vadd.f32 %v1063_v29, %v775_v20  ;;  %v1000_v30 = vmul.f32 %v712_v35, %v454_v11  ;;  %v841_v20 = vperm.slane %v2151_v0, 1  ;;  %v2214_v29 = vld [vmem:[#allocation2 + $0xb8] sm:$0xff] }
  0x86   :  { %1190 = vst [vmem:[#allocation7 + $0x98] sm:$0xff] %v1126_v57  ;;  %v2182_v57 = vperm.slane %v840_v13, 1  ;;  %v289_v37 = vsel %vm1394_vm2, 0.0, %v2185_v46  ;;  %v713_v13 = vsel %vm690_vm1, %v3366_v62, %v3365_v31  ;;  %v118_v31 = vld [vmem:[#allocation5 + $0x60] sm:$0x77] }
  0x87   :  { %3541 = vst [vmem:[#allocation84_spill] sm:$0xff] %v2170_v10  ;;  %v2219_v35 = vperm.slane %v841_v20, 1  ;;  %v1001_v47 = vmul.f32 %v713_v13, %v455_v63  ;;  %v3378_v20 = vrot.slane %v2214_v29, 1  ;;  %v3377_v63 = vrot.slane %v2216_v36, 1 }
  0x88   :  { %3542 = vst [vmem:[#allocation85_spill] sm:$0xff] %v2172_v12  ;;  %v936_v5 = vmul.f32 %v2182_v57, %v2134_v27  ;;  %v3372_v12 = vrot.slane %v2214_v29, 7  ;;  %v195_v13 = vperm.slane %v118_v31, 0 }
  0x89   :  { %3544 = vst [vmem:[#allocation86_spill] sm:$0xff] %v2182_v57  ;;  %v937_v62 = vmul.f32 %v2219_v35, %v2170_v10 }
  0x8a   :  { %3545 = vst [vmem:[#allocation87_spill] sm:$0xff] %v2185_v46  ;;  %v1064_v11 = vadd.f32 %v1000_v30, %v936_v5  ;;  %v360_v5 = vperm.slane %v2151_v0, 6  ;;  %v3373_v46 = vrot.slane %v2216_v36, 7 }
  0x8b   :  { %3546 = vst [vmem:[#allocation88_spill] sm:$0xff] %v2187_v55  ;;  %v2221_v55 = vperm.slane %v194_v44, 0 }
  0x8c   :  { %1191 = vst [vmem:[#allocation7 + $0xa0] sm:$0xff] %v1127_v8  ;;  %v616_v8 = vsel %vm561_vm0, %v3361_v25, %v3360_v48  ;;  %v1128_v48 = vadd.f32 %v1064_v11, %v776_v14  ;;  %v2223_v25 = vperm.slane %v360_v5, 2  ;;  %v617_v44 = vsel %vm561_vm0, %v3373_v46, %v3372_v12 }
  0x8d   :  { %3547 = vst [vmem:[#allocation89_spill] sm:$0xff] %v2214_v29  ;;  %v777_v30 = vmul.f32 %v616_v8, %v289_v37  ;;  %v290_v37 = vsel %vm1394_vm2, 0.0, %v2221_v55  ;;  %v842_v11 = vperm.slane %v2151_v0, 5  ;;  %v2244_v8 = vld [vmem:[#allocation2 + $0xc0] sm:$0xff]  ;;  %v1065_v5 = vadd.f32 %v1001_v47, %v937_v62 }
  0x8e   :  { %3548 = vst [vmem:[#allocation90_spill] sm:$0xff] %v2216_v36  ;;  %v456_v14 = vsel %vm1398_vm3, 0.0, %v2223_v25  ;;  %v2256_v46 = vperm.slane %v195_v13, 0  ;;  %v3384_v0 = vrot.slane %v2244_v8, 7  ;;  %v3389_v36 = vrot.slane %v2244_v8, 1  ;;  %v2278_v13 = vld [vmem:[#allocation2 + $0xc8] sm:$0xff] }
  0x8f   :  { %3549 = vst [vmem:[#allocation91_spill] sm:$0xff] %v2219_v35  ;;  %v361_v35 = vperm.slane %v118_v31, 2  ;;  %v2254_v10 = vperm.slane %v842_v11, 1  ;;  %v1129_v57 = vadd.f32 %v1065_v5, %v777_v30  ;;  %v843_v11 = vperm.slane %v118_v31, 1 }
  0x90   :  { %3550 = vst [vmem:[#allocation92_spill] sm:$0xff] %v2221_v55  ;;  %v2252_v55 = vld [vmem:[#allocation2 + $0x1c0] sm:$0xff]  ;;  %v196_v5 = vperm.slane %v118_v31, 4 }
  0x91   :  { %3551 = vst [vmem:[#allocation93_spill] sm:$0xff] %v2223_v25  ;;  %v778_v25 = vmul.f32 %v617_v44, %v290_v37  ;;  %v2259_v62 = vperm.slane %v361_v35, 2  ;;  %v3385_v47 = vrot.slane %v2252_v55, 7  ;;  %v938_v37 = vmul.f32 %v2254_v10, %v2214_v29 }
  0x92   :  { %1192 = vst [vmem:[#allocation7 + $0xa8] sm:$0xff] %v1128_v48  ;;  %v714_v48 = vsel %vm690_vm1, %v3378_v20, %v3377_v63  ;;  %v291_v44 = vsel %vm1394_vm2, 0.0, %v2256_v46  ;;  %v2290_v29 = vperm.slane %v196_v5, 0  ;;  %v844_v5 = vperm.slane %v118_v31, 5 }
  0x93   :  { %3552 = vst [vmem:[#allocation94_spill] sm:$0xff] %v2244_v8  ;;  %v1002_v12 = vmul.f32 %v714_v48, %v456_v14  ;;  %v3388_v14 = vrot.slane %v2252_v55, 1  ;;  %v457_v30 = vsel %vm1398_vm3, 0.0, %v2259_v62  ;;  %v618_v35 = vsel %vm561_vm0, %v3385_v47, %v3384_v0 }
  0x94   :  { %3553 = vst [vmem:[#allocation95_spill] sm:$0xff] %v2252_v55  ;;  %v362_v48 = vperm.slane %v118_v31, 6  ;;  %v779_v20 = vmul.f32 %v618_v35, %v291_v44  ;;  %v3390_v47 = vrot.slane %v2278_v13, 7  ;;  %v3564_v31 = vrot.slane %v2278_v13, 1 }
  0x95   :  { %3554 = vst [vmem:[#allocation96_spill] sm:$0xff] %v2254_v10  ;;  %v1066_v63 = vadd.f32 %v1002_v12, %v938_v37  ;;  %v2295_v12 = vld [vmem:[#allocation5 + $0x68] sm:$0x77] }
  0x96   :  { %3555 = vst [vmem:[#allocation97_spill] sm:$0xff] %v2256_v46  ;;  %v2288_v46 = vld [vmem:[#allocation2 + $0x1c8] sm:$0xff]  ;;  %v2292_v0 = vperm.slane %v362_v48, 2  ;;  %v2314_v48 = vld [vmem:[#allocation2 + $0xd0] sm:$0xff]  ;;  %v363_v44 = vperm.slane %v2295_v12, 2 }
  0x97   :  { %3556 = vst [vmem:[#allocation98_spill] sm:$0xff] %v2259_v62  ;;  %v2286_v62 = vperm.slane %v843_v11, 1  ;;  %v1130_v37 = vadd.f32 %v1066_v63, %v778_v25  ;;  %v292_v11 = vsel %vm1394_vm2, 0.0, %v2290_v29  ;;  %v3401_v35 = vrot.slane %v2288_v46, 1 }
  0x98   :  { %1193 = vst [vmem:[#allocation7 + $0xb0] sm:$0xff] %v1129_v57  ;;  %v715_v57 = vsel %vm690_vm1, %v3389_v36, %v3388_v14  ;;  %v3391_v14 = vrot.slane %v2288_v46, 7  ;;  %v197_v36 = vperm.slane %v2295_v12, 0  ;;  %v3409_v27 = vrot.slane %v2314_v48, 1 }
  0x99   :  { %3557 = vst [vmem:[#allocation99_spill] sm:$0xff] %v2278_v13  ;;  %v1003_v10 = vmul.f32 %v715_v57, %v457_v30  ;;  %v939_v55 = vmul.f32 %v2286_v62, %v2244_v8  ;;  %v458_v30 = vsel %vm1398_vm3, 0.0, %v2292_v0  ;;  %v2316_v57 = vld [vmem:[#allocation2 + $0x1d0] sm:$0xff] }
  0x9a   :  { %3558 = vst [vmem:[#allocation100_spill] sm:$0xff] %v2286_v62  ;;  %v619_v63 = vsel %vm561_vm0, %v3391_v14, %v3390_v47  ;;  %v3403_v47 = vrot.slane %v2314_v48, 7  ;;  %v2331_v62 = vperm.slane %v363_v44, 2  ;;  %v198_v44 = vperm.slane %v2295_v12, 4 }
  0x9b   :  { %3559 = vst [vmem:[#allocation101_spill] sm:$0xff] %v2288_v46  ;;  %v1067_v25 = vadd.f32 %v1003_v10, %v939_v55  ;;  %v716_v55 = vsel %vm690_vm1, %v3564_v31, %v3401_v35  ;;  %v780_v10 = vmul.f32 %v619_v63, %v292_v11  ;;  %v3404_v46 = vrot.slane %v2316_v57, 7  ;;  %v2360_v63 = vld [vmem:[#allocation2 + $0x1d8] sm:$0xff] }
  0x9c   :  { %3560 = vst [vmem:[#allocation102_spill] sm:$0xff] %v2290_v29  ;;  %v2329_v29 = vperm.slane %v197_v36, 0  ;;  %v3408_v31 = vrot.slane %v2316_v57, 1  ;;  %v459_v36 = vsel %vm1398_vm3, 0.0, %v2331_v62 }
  0x9d   :  { %3561 = vst [vmem:[#allocation103_spill] sm:$0xff] %v2292_v0  ;;  %v1131_v14 = vadd.f32 %v1067_v25, %v779_v20  ;;  %v1004_v0 = vmul.f32 %v716_v55, %v458_v30  ;;  %v845_v20 = vperm.slane %v2295_v12, 1  ;;  %v2358_v25 = vld [vmem:[#allocation2 + $0xd8] sm:$0xff] }
  0x9e   :  { %1194 = vst [vmem:[#allocation7 + $0xb8] sm:$0xff] %v1130_v37  ;;  %v2326_v37 = vperm.slane %v844_v5, 1  ;;  %v293_v11 = vsel %vm1394_vm2, 0.0, %v2329_v29  ;;  %v717_v5 = vsel %vm690_vm1, %v3409_v27, %v3408_v31  ;;  %v120_v31 = vld [vmem:[#allocation5 + $0x70] sm:$0x77] }
  0x9f   :  { %3562 = vst [vmem:[#allocation104_spill] sm:$0xff] %v2314_v48  ;;  %v2363_v55 = vperm.slane %v845_v20, 1  ;;  %v1005_v35 = vmul.f32 %v717_v5, %v459_v36  ;;  %v3421_v20 = vrot.slane %v2358_v25, 1  ;;  %v3420_v36 = vrot.slane %v2360_v63, 1 }
  0xa0   :  { %3563 = vst [vmem:[#allocation105_spill] sm:$0xff] %v2316_v57  ;;  %v940_v8 = vmul.f32 %v2326_v37, %v2278_v13  ;;  %v3415_v57 = vrot.slane %v2358_v25, 7  ;;  %v199_v5 = vperm.slane %v120_v31, 0 }
  0xa1   :  { %3565 = vst [vmem:[#allocation106_spill] sm:$0xff] %v2326_v37  ;;  %v941_v27 = vmul.f32 %v2363_v55, %v2314_v48 }
  0xa2   :  { %3566 = vst [vmem:[#allocation107_spill] sm:$0xff] %v2329_v29  ;;  %v1068_v30 = vadd.f32 %v1004_v0, %v940_v8  ;;  %v364_v8 = vperm.slane %v2295_v12, 6  ;;  %v3416_v29 = vrot.slane %v2360_v63, 7 }
  0xa3   :  { %3567 = vst [vmem:[#allocation108_spill] sm:$0xff] %v2331_v62  ;;  %v2365_v62 = vperm.slane %v198_v44, 0 }
  0xa4   :  { %1195 = vst [vmem:[#allocation7 + $0xc0] sm:$0xff] %v1131_v14  ;;  %v620_v14 = vsel %vm561_vm0, %v3404_v46, %v3403_v47  ;;  %v1132_v47 = vadd.f32 %v1068_v30, %v780_v10  ;;  %v2367_v46 = vperm.slane %v364_v8, 2  ;;  %v621_v44 = vsel %vm561_vm0, %v3416_v29, %v3415_v57 }
  0xa5   :  { %3568 = vst [vmem:[#allocation109_spill] sm:$0xff] %v2358_v25  ;;  %v781_v0 = vmul.f32 %v620_v14, %v293_v11  ;;  %v294_v11 = vsel %vm1394_vm2, 0.0, %v2365_v62  ;;  %v846_v30 = vperm.slane %v2295_v12, 5  ;;  %v2388_v14 = vld [vmem:[#allocation2 + $0xe0] sm:$0xff]  ;;  %v1069_v8 = vadd.f32 %v1005_v35, %v941_v27 }
  0xa6   :  { %3569 = vst [vmem:[#allocation110_spill] sm:$0xff] %v2360_v63  ;;  %v460_v10 = vsel %vm1398_vm3, 0.0, %v2367_v46  ;;  %v2400_v29 = vperm.slane %v199_v5, 0  ;;  %v3427_v12 = vrot.slane %v2388_v14, 7  ;;  %v3434_v63 = vrot.slane %v2388_v14, 1  ;;  %v2422_v5 = vld [vmem:[#allocation2 + $0xe8] sm:$0xff] }
  0xa7   :  { %3570 = vst [vmem:[#allocation111_spill] sm:$0xff] %v2363_v55  ;;  %v365_v55 = vperm.slane %v120_v31, 2  ;;  %v2398_v48 = vperm.slane %v846_v30, 1  ;;  %v1133_v37 = vadd.f32 %v1069_v8, %v781_v0  ;;  %v847_v30 = vperm.slane %v120_v31, 1 }
  0xa8   :  { %3571 = vst [vmem:[#allocation112_spill] sm:$0xff] %v2365_v62  ;;  %v2396_v62 = vld [vmem:[#allocation2 + $0x1e0] sm:$0xff]  ;;  %v200_v8 = vperm.slane %v120_v31, 4 }
  0xa9   :  { %3572 = vst [vmem:[#allocation113_spill] sm:$0xff] %v2367_v46  ;;  %v782_v46 = vmul.f32 %v621_v44, %v294_v11  ;;  %v2403_v27 = vperm.slane %v365_v55, 2  ;;  %v3428_v35 = vrot.slane %v2396_v62, 7  ;;  %v942_v11 = vmul.f32 %v2398_v48, %v2358_v25 }
  0xaa   :  { %1196 = vst [vmem:[#allocation7 + $0xc8] sm:$0xff] %v1132_v47  ;;  %v718_v47 = vsel %vm690_vm1, %v3421_v20, %v3420_v36  ;;  %v295_v44 = vsel %vm1394_vm2, 0.0, %v2400_v29  ;;  %v2434_v25 = vperm.slane %v200_v8, 0  ;;  %v848_v8 = vperm.slane %v120_v31, 5 }
  0xab   :  { %3573 = vst [vmem:[#allocation114_spill] sm:$0xff] %v2388_v14  ;;  %v1006_v57 = vmul.f32 %v718_v47, %v460_v10  ;;  %v3433_v10 = vrot.slane %v2396_v62, 1  ;;  %v461_v0 = vsel %vm1398_vm3, 0.0, %v2403_v27  ;;  %v622_v55 = vsel %vm561_vm0, %v3428_v35, %v3427_v12 }
  0xac   :  { %3574 = vst [vmem:[#allocation115_spill] sm:$0xff] %v2396_v62  ;;  %v366_v47 = vperm.slane %v120_v31, 6  ;;  %v783_v20 = vmul.f32 %v622_v55, %v295_v44  ;;  %v3436_v35 = vrot.slane %v2422_v5, 7  ;;  %v3445_v44 = vrot.slane %v2422_v5, 1 }
  0xad   :  { %3575 = vst [vmem:[#allocation116_spill] sm:$0xff] %v2398_v48  ;;  %v1070_v36 = vadd.f32 %v1006_v57, %v942_v11  ;;  %v121_v57 = vld [vmem:[#allocation5 + $0x78] sm:$0x77]  ;;  %v2466_v31 = vperm.slane %v848_v8, 1 }
  0xae   :  { %3576 = vst [vmem:[#allocation117_spill] sm:$0xff] %v2400_v29  ;;  %v2432_v29 = vld [vmem:[#allocation2 + $0x1e8] sm:$0xff]  ;;  %v2436_v12 = vperm.slane %v366_v47, 2  ;;  %v2456_v47 = vld [vmem:[#allocation2 + $0xf0] sm:$0xff] }
  0xaf   :  { %3577 = vst [vmem:[#allocation118_spill] sm:$0xff] %v2403_v27  ;;  %v2430_v27 = vperm.slane %v847_v30, 1  ;;  %v1134_v11 = vadd.f32 %v1070_v36, %v782_v46  ;;  %v3437_v13 = vrot.slane %v2432_v29, 7  ;;  %v296_v30 = vsel %vm1394_vm2, 0.0, %v2434_v25 }
  0xb0   :  { %1197 = vst [vmem:[#allocation7 + $0xd0] sm:$0xff] %v1133_v37  ;;  %v719_v37 = vsel %vm690_vm1, %v3434_v63, %v3433_v10  ;;  %v3444_v55 = vrot.slane %v2432_v29, 1  ;;  %v201_v10 = vperm.slane %v121_v57, 0  ;;  %v367_v63 = vperm.slane %v121_v57, 2 }
  0xb1   :  { %3578 = vst [vmem:[#allocation119_spill] sm:$0xff] %v2430_v27  ;;  %v1007_v48 = vmul.f32 %v719_v37, %v461_v0  ;;  %v943_v62 = vmul.f32 %v2430_v27, %v2388_v14  ;;  %v462_v0 = vsel %vm1398_vm3, 0.0, %v2436_v12  ;;  %v623_v36 = vsel %vm561_vm0, %v3437_v13, %v3436_v35  ;;  %v2458_v37 = vld [vmem:[#allocation2 + $0x1f0] sm:$0xff] }
  0xb2   :  { %3579 = vst [vmem:[#allocation120_spill] sm:$0xff] %v2432_v29  ;;  %v2469_v13 = vperm.slane %v201_v10, 0  ;;  %v944_v27 = vmul.f32 %v2466_v31, %v2422_v5  ;;  %v3449_v29 = vrot.slane %v2458_v37, 7  ;;  %v3453_v14 = vrot.slane %v2456_v47, 1 }
  0xb3   :  { %3580 = vst [vmem:[#allocation121_spill] sm:$0xff] %v2434_v25  ;;  %v1071_v46 = vadd.f32 %v1007_v48, %v943_v62  ;;  %v720_v62 = vsel %vm690_vm1, %v3445_v44, %v3444_v55  ;;  %v784_v48 = vmul.f32 %v623_v36, %v296_v30  ;;  %v2471_v25 = vperm.slane %v367_v63, 2  ;;  %v2498_v36 = vld [vmem:[#allocation2 + $0x1f8] sm:$0xff] }
  0xb4   :  { %3581 = vst [vmem:[#allocation122_spill] sm:$0xff] %v2436_v12  ;;  %v1008_v35 = vmul.f32 %v720_v62, %v462_v0  ;;  %v3452_v55 = vrot.slane %v2458_v37, 1  ;;  %v297_v30 = vsel %vm1394_vm2, 0.0, %v2469_v13  ;;  %v849_v63 = vperm.slane %v121_v57, 1 }
  0xb5   :  { %1198 = vst [vmem:[#allocation7 + $0xd8] sm:$0xff] %v1134_v11  ;;  %v3448_v11 = vrot.slane %v2456_v47, 7  ;;  %v1135_v12 = vadd.f32 %v1071_v46, %v783_v20  ;;  %v463_v20 = vsel %vm1398_vm3, 0.0, %v2471_v25  ;;  %v202_v10 = vperm.slane %v121_v57, 4  ;;  %v2496_v46 = vld [vmem:[#allocation2 + $0xf8] sm:$0xff] }
  0xb6   :  { %3582 = vst [vmem:[#allocation123_spill] sm:$0xff] %v2458_v37  ;;  %v1072_v0 = vadd.f32 %v1008_v35, %v944_v27  ;;  %v368_v62 = vperm.slane %v121_v57, 6  ;;  %v2500_v35 = vperm.slane %v849_v63, 1  ;;  %v3455_v37 = vrot.slane %v2498_v36, 7 }
  0xb7   :  { %3583 = vst [vmem:[#allocation124_spill] sm:$0xff] %v2469_v13  ;;  %v624_v8 = vsel %vm561_vm0, %v3449_v29, %v3448_v11  ;;  %v3454_v29 = vrot.slane %v2496_v46, 7 }
  0xb8   :  { %3584 = vst [vmem:[#allocation125_spill] sm:$0xff] %v2471_v25  ;;  %v785_v27 = vmul.f32 %v624_v8, %v297_v30  ;;  %v2502_v25 = vperm.slane %v202_v10, 0  ;;  %v1136_v13 = vadd.f32 %v1072_v0, %v784_v48  ;;  %v2504_v11 = vperm.slane %v368_v62, 2 }
  0xb9   :  { %1199 = vst [vmem:[#allocation7 + $0xe0] sm:$0xff] %v1135_v12  ;;  %v721_v12 = vsel %vm690_vm1, %v3453_v14, %v3452_v55  ;;  %v945_v55 = vmul.f32 %v2500_v35, %v2456_v47  ;;  %v3459_v30 = vrot.slane %v2496_v46, 1  ;;  %v625_v63 = vsel %vm561_vm0, %v3455_v37, %v3454_v29 }
  0xba   :  { %3585 = vst [vmem:[#allocation126_spill] sm:$0xff] %v2498_v36  ;;  %v1009_v44 = vmul.f32 %v721_v12, %v463_v20  ;;  %v298_v14 = vsel %vm1394_vm2, 0.0, %v2502_v25  ;;  %v3458_v20 = vrot.slane %v2498_v36, 1  ;;  %v464_v48 = vsel %vm1398_vm3, 0.0, %v2504_v11 }
  0xbb   :  { %3586 = vst [vmem:[#allocation127_spill] sm:$0xff] %v2504_v11  ;;  %v850_v10 = vperm.slane %v121_v57, 5  ;;  %v786_v7 = vmul.f32 %v625_v63, %v298_v14  ;;  %v3587_v8 = vrot.slane %v1392_v4, 7  ;;  %v3588_v12 = vrot.slane %v1390_v3, 7  ;;  %v1260_v14 = vld [vmem:[#allocation2 + $0x100] sm:$0xff] }
  0xbc   :  { %1200 = vst [vmem:[#allocation7 + $0xe8] sm:$0xff] %v1136_v13  ;;  %v1073_v0 = vadd.f32 %v1009_v44, %v945_v55  ;;  %v722_v13 = vsel %vm690_vm1, %v3459_v30, %v3458_v20  ;;  %v136_v37 = vand.u32 7, %v124_v6  ;;  %v3589_v44 = vrot.slane %v1390_v3, 1 }
  0xbd   :  { %v562_v62 = vsel %vm561_vm0, %v3588_v12, %v3587_v8  ;;  %v2537_v29 = vperm.slane %v850_v10, 1  ;;  %v1010_v57 = vmul.f32 %v722_v13, %v464_v48  ;;  %v3590_v55 = vrot.slane %v1392_v4, 1 }
  0xbe   :  { %v1137_v20 = vadd.f32 %v1073_v0, %v785_v27  ;;  %v947_v63 = vmul.f32 %v1260_v14, %v1424_v22  ;;  %v3591_v30 = vrot.slane %v1426_v23, 7  ;;  %v3592_v11 = vrot.slane %v1416_v19, 7  ;;  %v1261_v0 = vld [vmem:[#allocation2 + $0x108] sm:$0xff] }
  0xbf   :  { %v723_v36 = vsel %vm690_vm1, %v3590_v55, %v3589_v44  ;;  %v3593_v48 = vrot.slane %v1416_v19, 1  ;;  %v3594_v3 = vrot.slane %v1426_v23, 1  ;;  %v946_v27 = vmul.f32 %v2537_v29, %v2496_v46 }
  0xc0   :  { %v563_v10 = vsel %vm561_vm0, %v3592_v11, %v3591_v30  ;;  %vm2560_vm4 = vcmp.eq.s32.totalorder %v136_v37, 0  ;;  %vm2564_vm5 = vcmp.eq.s32.totalorder %v136_v37, 7  ;;  %v948_v11 = vmul.f32 %v1261_v0, %v1468_v50  ;;  %1201 = vst [vmem:[#allocation7 + $0xf0] sm:$0xff] %v1137_v20 }
  0xc1   :  { %v724_v4 = vsel %vm690_vm1, %v3594_v3, %v3593_v48  ;;  %v299_v19 = vsel %vm2560_vm4, 0.0, %v1406_v16  ;;  %v465_v23 = vsel %vm2564_vm5, 0.0, %v1408_v17  ;;  %v300_v30 = vsel %vm2560_vm4, 0.0, %v1428_v24  ;;  %v1262_v48 = vld [vmem:[#allocation2 + $0x110] sm:$0xff] }
  0xc2   :  { %v466_v37 = vsel %vm2564_vm5, 0.0, %v1437_v28  ;;  %v1074_v13 = vadd.f32 %v1010_v57, %v946_v27  ;;  %v787_v8 = vmul.f32 %v562_v62, %v299_v19  ;;  %v1011_v50 = vmul.f32 %v723_v36, %v465_v23 }
  0xc3   :  { %v788_v20 = vmul.f32 %v563_v10, %v300_v30  ;;  %v1012_v12 = vmul.f32 %v724_v4, %v466_v37  ;;  %v301_v16 = vsel %vm2560_vm4, 0.0, %v1470_v52  ;;  %v467_v17 = vsel %vm2564_vm5, 0.0, %v1472_v53  ;;  %v1263_v30 = vld [vmem:[#allocation2 + $0x118] sm:$0xff] }
  0xc4   :  { %v3599_v44 = vrot.slane %v1458_v43, 7  ;;  %v3600_v24 = vrot.slane %v1456_v42, 7  ;;  %v1138_v57 = vadd.f32 %v1074_v13, %v786_v7  ;;  %v1075_v62 = vadd.f32 %v1011_v50, %v947_v63 }
  0xc5   :  { %v3601_v36 = vrot.slane %v1456_v42, 1  ;;  %v3602_v55 = vrot.slane %v1458_v43, 1  ;;  %v1076_v10 = vadd.f32 %v1012_v12, %v948_v11  ;;  %v949_v53 = vmul.f32 %v1262_v48, %v1500_v9 }
  0xc6   :  { %v564_v28 = vsel %vm561_vm0, %v3600_v24, %v3599_v44  ;;  %v302_v4 = vsel %vm2560_vm4, 0.0, %v1502_v15  ;;  %1202 = vst [vmem:[#allocation7 + $0xf8] sm:$0xff] %v1138_v57  ;;  %v1139_v7 = vadd.f32 %v1075_v62, %v787_v8  ;;  %v468_v42 = vsel %vm2564_vm5, 0.0, %v1504_v18 }
  0xc7   :  { %v725_v52 = vsel %vm690_vm1, %v3602_v55, %v3601_v36  ;;  %v789_v14 = vmul.f32 %v564_v28, %v301_v16  ;;  %v3603_v43 = vrot.slane %v1498_v2, 7  ;;  %v3604_v63 = vrot.slane %v1487_v60, 7 }
  0xc8   :  { %v1013_v3 = vmul.f32 %v725_v52, %v467_v17  ;;  %v3605_v9 = vrot.slane %v1487_v60, 1  ;;  %v3606_v0 = vrot.slane %v1498_v2, 1  ;;  %v1140_v11 = vadd.f32 %v1076_v10, %v788_v20  ;;  %1203 = vst [vmem:[#allocation7 + $0x100] sm:$0xff] %v1139_v7  ;;  %v1264_v17 = vld [vmem:[#allocation2 + $0x120] sm:$0xff] }
  0xc9   :  { %v565_v27 = vsel %vm561_vm0, %v3604_v63, %v3603_v43  ;;  %v950_v18 = vmul.f32 %v1263_v30, %v1534_v54  ;;  %v303_v13 = vsel %vm2560_vm4, 0.0, %v1536_v34  ;;  %v469_v60 = vsel %vm2564_vm5, 0.0, %v1539_v61 }
  0xca   :  { %v726_v15 = vsel %vm690_vm1, %v3606_v0, %v3605_v9  ;;  %v1077_v19 = vadd.f32 %v1013_v3, %v949_v53  ;;  %v790_v23 = vmul.f32 %v565_v27, %v302_v4  ;;  %v3607_v2 = vrot.slane %v1532_v49, 7  ;;  %1204 = vst [vmem:[#allocation7 + $0x108] sm:$0xff] %v1140_v11 }
  0xcb   :  { %v1014_v37 = vmul.f32 %v726_v15, %v468_v42  ;;  %v3608_v8 = vrot.slane %v1524_v40, 7  ;;  %v3609_v54 = vrot.slane %v1524_v40, 1  ;;  %v3610_v12 = vrot.slane %v1532_v49, 1  ;;  %v1266_v42 = vld [vmem:[#allocation2 + $0x130] sm:$0xff] }
  0xcc   :  { %v1141_v20 = vadd.f32 %v1077_v19, %v789_v14  ;;  %v951_v61 = vmul.f32 %v1264_v17, %v1566_v45  ;;  %v304_v28 = vsel %vm2560_vm4, 0.0, %v1570_v33  ;;  %v470_v57 = vsel %vm2564_vm5, 0.0, %v1572_v58  ;;  %v1265_v33 = vld [vmem:[#allocation2 + $0x128] sm:$0xff]  ;;  %v3619_v15 = vld [vmem:[#allocation13_spill] sm:$0xff]  ;;  %v3622_v19 = vld [vmem:[#allocation11_spill] sm:$0xff] }
  0xcd   :  { %v566_v50 = vsel %vm561_vm0, %v3608_v8, %v3607_v2  ;;  %v727_v34 = vsel %vm690_vm1, %v3610_v12, %v3609_v54  ;;  %v1078_v44 = vadd.f32 %v1014_v37, %v950_v18  ;;  %v3611_v40 = vrot.slane %v1568_v51, 7  ;;  %v1267_v2 = vld [vmem:[#allocation2 + $0x138] sm:$0xff]  ;;  %v3626_v8 = vld [vmem:[#allocation16_spill] sm:$0xff]  ;;  %v3627_v54 = vld [vmem:[#allocation17_spill] sm:$0xff] }
  0xce   :  { %v791_v16 = vmul.f32 %v566_v50, %v303_v13  ;;  %v1015_v24 = vmul.f32 %v727_v34, %v469_v60  ;;  %1205 = vst [vmem:[#allocation7 + $0x110] sm:$0xff] %v1141_v20  ;;  %v3612_v49 = vrot.slane %v1558_v32, 7  ;;  %v3613_v45 = vrot.slane %v1558_v32, 1  ;;  %v3628_v34 = vld [vmem:[#allocation18_spill] sm:$0xff]  ;;  %v3629_v17 = vld [vmem:[#allocation15_spill] sm:$0xff] }
  0xcf   :  { %v3614_v36 = vrot.slane %v1568_v51, 1  ;;  %v952_v52 = vmul.f32 %v1265_v33, %v1606_v59  ;;  %v305_v58 = vsel %vm2560_vm4, 0.0, %v1609_v21  ;;  %v1142_v14 = vadd.f32 %v1078_v44, %v790_v23  ;;  %v3631_v44 = vld [vmem:[#allocation14_spill] sm:$0xff] }
  0xd0   :  { %v567_v62 = vsel %vm561_vm0, %v3612_v49, %v3611_v40  ;;  %v1079_v10 = vadd.f32 %v1015_v24, %v951_v61  ;;  %v471_v32 = vsel %vm2564_vm5, 0.0, %v1611_v56  ;;  %v3615_v51 = vrot.slane %v1596_v41, 7 }
  0xd1   :  { %v728_v55 = vsel %vm690_vm1, %v3614_v36, %v3613_v45  ;;  %v792_v48 = vmul.f32 %v567_v62, %v304_v28  ;;  %v3616_v3 = vrot.slane %v1594_v39, 7  ;;  %v3617_v59 = vrot.slane %v1594_v39, 1  ;;  %1206 = vst [vmem:[#allocation7 + $0x118] sm:$0xff] %v1142_v14  ;;  %v1268_v36 = vld [vmem:[#allocation2 + $0x140] sm:$0xff]  ;;  %v3636_v14 = vld [vmem:[#allocation22_spill] sm:$0xff] }
  0xd2   :  { %v1016_v53 = vmul.f32 %v728_v55, %v470_v57  ;;  %v3618_v7 = vrot.slane %v1596_v41, 1  ;;  %v953_v43 = vmul.f32 %v1266_v42, %v1643_v26  ;;  %v1143_v63 = vadd.f32 %v1079_v10, %v791_v16  ;;  %v3620_v41 = vld [vmem:[#allocation12_spill] sm:$0xff] }
  0xd3   :  { %v568_v4 = vsel %vm561_vm0, %v3616_v3, %v3615_v51  ;;  %v306_v0 = vsel %vm2560_vm4, 0.0, %v1645_v38  ;;  %v472_v39 = vsel %vm2564_vm5, 0.0, %v3619_v15  ;;  %v3621_v11 = vrot.slane %v3620_v41, 7  ;;  %v3635_v55 = vld [vmem:[#allocation20_spill] sm:$0xff]  ;;  %v3640_v3 = vld [vmem:[#allocation19_spill] sm:$0xff] }
  0xd4   :  { %v729_v21 = vsel %vm690_vm1, %v3618_v7, %v3617_v59  ;;  %v1080_v56 = vadd.f32 %v1016_v53, %v952_v52  ;;  %v793_v27 = vmul.f32 %v568_v4, %v305_v58  ;;  %v3623_v23 = vrot.slane %v3622_v19, 7  ;;  %1207 = vst [vmem:[#allocation7 + $0x120] sm:$0xff] %v1143_v63  ;;  %v3644_v63 = vld [vmem:[#allocation26_spill] sm:$0xff] }
  0xd5   :  { %v1017_v9 = vmul.f32 %v729_v21, %v471_v32  ;;  %v3624_v30 = vrot.slane %v3622_v19, 1  ;;  %v3625_v18 = vrot.slane %v3620_v41, 1  ;;  %v954_v50 = vmul.f32 %v1267_v2, %v3626_v8  ;;  %v3638_v32 = vld [vmem:[#allocation21_spill] sm:$0xff]  ;;  %v3653_v8 = vld [vmem:[#allocation31_spill] sm:$0xff] }
  0xd6   :  { %v569_v26 = vsel %vm561_vm0, %v3623_v23, %v3621_v11  ;;  %v1144_v38 = vadd.f32 %v1080_v56, %v792_v48  ;;  %v307_v12 = vsel %vm2560_vm4, 0.0, %v3627_v54  ;;  %v473_v16 = vsel %vm2564_vm5, 0.0, %v3628_v34  ;;  %v3637_v48 = vld [vmem:[#allocation23_spill] sm:$0xff]  ;;  %v3646_v11 = vld [vmem:[#allocation28_spill] sm:$0xff]  ;;  %v3647_v23 = vld [vmem:[#allocation25_spill] sm:$0xff] }
  0xd7   :  { %v730_v37 = vsel %vm690_vm1, %v3625_v18, %v3624_v30  ;;  %v1081_v13 = vadd.f32 %v1017_v9, %v953_v43  ;;  %v794_v60 = vmul.f32 %v569_v26, %v306_v0  ;;  %v3630_v61 = vrot.slane %v3629_v17, 7  ;;  %v1269_v43 = vld [vmem:[#allocation2 + $0x148] sm:$0xff]  ;;  %v1270_v2 = vld [vmem:[#allocation2 + $0x150] sm:$0xff] }
  0xd8   :  { %v1018_v20 = vmul.f32 %v730_v37, %v472_v39  ;;  %v3632_v24 = vrot.slane %v3631_v44, 7  ;;  %1208 = vst [vmem:[#allocation7 + $0x128] sm:$0xff] %v1144_v38  ;;  %v3633_v40 = vrot.slane %v3631_v44, 1  ;;  %v3634_v49 = vrot.slane %v3629_v17, 1  ;;  %v3649_v30 = vld [vmem:[#allocation24_spill] sm:$0xff] }
  0xd9   :  { %v1145_v57 = vadd.f32 %v1081_v13, %v793_v27  ;;  %v955_v33 = vmul.f32 %v1268_v36, %v3635_v55  ;;  %v308_v10 = vsel %vm2560_vm4, 0.0, %v3636_v14  ;;  %v474_v53 = vsel %vm2564_vm5, 0.0, %v3637_v48  ;;  %v3645_v27 = vld [vmem:[#allocation27_spill] sm:$0xff]  ;;  %v3662_v14 = vld [vmem:[#allocation36_spill] sm:$0xff] }
  0xda   :  { %v570_v28 = vsel %vm561_vm0, %v3632_v24, %v3630_v61  ;;  %v731_v62 = vsel %vm690_vm1, %v3634_v49, %v3633_v40  ;;  %v1082_v52 = vadd.f32 %v1018_v20, %v954_v50  ;;  %v3639_v51 = vrot.slane %v3638_v32, 7  ;;  %v3655_v61 = vld [vmem:[#allocation33_spill] sm:$0xff]  ;;  %v3656_v24 = vld [vmem:[#allocation30_spill] sm:$0xff] }
  0xdb   :  { %v795_v45 = vmul.f32 %v570_v28, %v307_v12  ;;  %v1019_v58 = vmul.f32 %v731_v62, %v473_v16  ;;  %1209 = vst [vmem:[#allocation7 + $0x130] sm:$0xff] %v1145_v57  ;;  %v3641_v4 = vrot.slane %v3640_v3, 7  ;;  %v3642_v7 = vrot.slane %v3640_v3, 1  ;;  %v3654_v16 = vld [vmem:[#allocation32_spill] sm:$0xff]  ;;  %v3658_v57 = vld [vmem:[#allocation29_spill] sm:$0xff] }
  0xdc   :  { %v3643_v21 = vrot.slane %v3638_v32, 1  ;;  %v956_v56 = vmul.f32 %v1269_v43, %v3644_v63  ;;  %v309_v9 = vsel %vm2560_vm4, 0.0, %v3645_v27  ;;  %v1146_v0 = vadd.f32 %v1082_v52, %v794_v60 }
  0xdd   :  { %v571_v59 = vsel %vm561_vm0, %v3641_v4, %v3639_v51  ;;  %v1083_v15 = vadd.f32 %v1019_v58, %v955_v33  ;;  %v475_v19 = vsel %vm2564_vm5, 0.0, %v3646_v11  ;;  %v3648_v26 = vrot.slane %v3647_v23, 7  ;;  %v1271_v58 = vld [vmem:[#allocation2 + $0x158] sm:$0xff]  ;;  %v3665_v4 = vld [vmem:[#allocation35_spill] sm:$0xff] }
  0xde   :  { %v732_v42 = vsel %vm690_vm1, %v3643_v21, %v3642_v7  ;;  %v796_v39 = vmul.f32 %v571_v59, %v308_v10  ;;  %v3650_v18 = vrot.slane %v3649_v30, 7  ;;  %v3651_v38 = vrot.slane %v3649_v30, 1  ;;  %1210 = vst [vmem:[#allocation7 + $0x138] sm:$0xff] %v1146_v0  ;;  %v3664_v51 = vld [vmem:[#allocation38_spill] sm:$0xff]  ;;  %v1272_v0 = vld [vmem:[#allocation2 + $0x160] sm:$0xff] }
  0xdf   :  { %v1020_v41 = vmul.f32 %v732_v42, %v474_v53  ;;  %v3652_v13 = vrot.slane %v3647_v23, 1  ;;  %v957_v50 = vmul.f32 %v1270_v2, %v3653_v8  ;;  %v1147_v20 = vadd.f32 %v1083_v15, %v795_v45  ;;  %v3663_v53 = vld [vmem:[#allocation37_spill] sm:$0xff]  ;;  %v3667_v7 = vld [vmem:[#allocation34_spill] sm:$0xff]  ;;  %v3671_v15 = vld [vmem:[#allocation40_spill] sm:$0xff] }
  0xe0   :  { %v572_v37 = vsel %vm561_vm0, %v3650_v18, %v3648_v26  ;;  %v310_v17 = vsel %vm2560_vm4, 0.0, %v3654_v16  ;;  %v476_v44 = vsel %vm2564_vm5, 0.0, %v3655_v61  ;;  %v3657_v28 = vrot.slane %v3656_v24, 7  ;;  %v3673_v26 = vld [vmem:[#allocation43_spill] sm:$0xff]  ;;  %v3674_v18 = vld [vmem:[#allocation41_spill] sm:$0xff] }
  0xe1   :  { %v733_v60 = vsel %vm690_vm1, %v3652_v13, %v3651_v38  ;;  %v1084_v54 = vadd.f32 %v1020_v41, %v956_v56  ;;  %v797_v12 = vmul.f32 %v572_v37, %v309_v9  ;;  %v3659_v40 = vrot.slane %v3658_v57, 7  ;;  %1211 = vst [vmem:[#allocation7 + $0x140] sm:$0xff] %v1147_v20  ;;  %v3676_v38 = vld [vmem:[#allocation39_spill] sm:$0xff]  ;;  %v1273_v20 = vld [vmem:[#allocation2 + $0x168] sm:$0xff] }
  0xe2   :  { %v1021_v34 = vmul.f32 %v733_v60, %v475_v19  ;;  %v3660_v62 = vrot.slane %v3658_v57, 1  ;;  %v3661_v45 = vrot.slane %v3656_v24, 1  ;;  %v958_v10 = vmul.f32 %v1271_v58, %v3662_v14  ;;  %v3672_v19 = vld [vmem:[#allocation42_spill] sm:$0xff]  ;;  %v1274_v58 = vld [vmem:[#allocation2 + $0x170] sm:$0xff]  ;;  %v3689_v14 = vld [vmem:[#allocation51_spill] sm:$0xff] }
  0xe3   :  { %v573_v49 = vsel %vm561_vm0, %v3659_v40, %v3657_v28  ;;  %v1148_v55 = vadd.f32 %v1084_v54, %v796_v39  ;;  %v311_v32 = vsel %vm2560_vm4, 0.0, %v3663_v53  ;;  %v477_v3 = vsel %vm2564_vm5, 0.0, %v3664_v51  ;;  %v3680_v54 = vld [vmem:[#allocation46_spill] sm:$0xff]  ;;  %v3682_v28 = vld [vmem:[#allocation48_spill] sm:$0xff]  ;;  %v3683_v40 = vld [vmem:[#allocation45_spill] sm:$0xff] }
  0xe4   :  { %v734_v36 = vsel %vm690_vm1, %v3661_v45, %v3660_v62  ;;  %v1085_v33 = vadd.f32 %v1021_v34, %v957_v50  ;;  %v798_v52 = vmul.f32 %v573_v49, %v310_v17  ;;  %v3666_v59 = vrot.slane %v3665_v4, 7  ;;  %v3681_v34 = vld [vmem:[#allocation47_spill] sm:$0xff]  ;;  %v3685_v62 = vld [vmem:[#allocation44_spill] sm:$0xff] }
  0xe5   :  { %v1022_v48 = vmul.f32 %v734_v36, %v476_v44  ;;  %v3668_v21 = vrot.slane %v3667_v7, 7  ;;  %1212 = vst [vmem:[#allocation7 + $0x148] sm:$0xff] %v1148_v55  ;;  %v3669_v63 = vrot.slane %v3667_v7, 1  ;;  %v3670_v56 = vrot.slane %v3665_v4, 1 }
  0xe6   :  { %v1149_v43 = vadd.f32 %v1085_v33, %v797_v12  ;;  %v959_v39 = vmul.f32 %v1272_v0, %v3671_v15  ;;  %v312_v23 = vsel %vm2560_vm4, 0.0, %v3672_v19  ;;  %v478_v30 = vsel %vm2564_vm5, 0.0, %v3673_v26  ;;  %v3698_v19 = vld [vmem:[#allocation56_spill] sm:$0xff] }
  0xe7   :  { %v574_v42 = vsel %vm561_vm0, %v3668_v21, %v3666_v59  ;;  %v735_v27 = vsel %vm690_vm1, %v3670_v56, %v3669_v63  ;;  %v1086_v41 = vadd.f32 %v1022_v48, %v958_v10  ;;  %v3675_v37 = vrot.slane %v3674_v18, 7  ;;  %v3691_v59 = vld [vmem:[#allocation53_spill] sm:$0xff]  ;;  %v3692_v21 = vld [vmem:[#allocation50_spill] sm:$0xff] }
  0xe8   :  { %v799_v9 = vmul.f32 %v574_v42, %v311_v32  ;;  %v1023_v11 = vmul.f32 %v735_v27, %v477_v3  ;;  %1213 = vst [vmem:[#allocation7 + $0x150] sm:$0xff] %v1149_v43  ;;  %v3677_v13 = vrot.slane %v3676_v38, 7  ;;  %v3678_v2 = vrot.slane %v3676_v38, 1  ;;  %v3690_v3 = vld [vmem:[#allocation52_spill] sm:$0xff]  ;;  %v3694_v43 = vld [vmem:[#allocation49_spill] sm:$0xff] }
  0xe9   :  { %v3679_v8 = vrot.slane %v3674_v18, 1  ;;  %v960_v12 = vmul.f32 %v1273_v20, %v3680_v54  ;;  %v313_v16 = vsel %vm2560_vm4, 0.0, %v3681_v34  ;;  %v1150_v17 = vadd.f32 %v1086_v41, %v798_v52 }
  0xea   :  { %v575_v60 = vsel %vm561_vm0, %v3677_v13, %v3675_v37  ;;  %v1087_v61 = vadd.f32 %v1023_v11, %v959_v39  ;;  %v479_v57 = vsel %vm2564_vm5, 0.0, %v3682_v28  ;;  %v3684_v49 = vrot.slane %v3683_v40, 7  ;;  %v1275_v11 = vld [vmem:[#allocation2 + $0x178] sm:$0xff]  ;;  %v3701_v13 = vld [vmem:[#allocation55_spill] sm:$0xff] }
  0xeb   :  { %v736_v50 = vsel %vm690_vm1, %v3679_v8, %v3678_v2  ;;  %v800_v44 = vmul.f32 %v575_v60, %v312_v23  ;;  %v3686_v45 = vrot.slane %v3685_v62, 7  ;;  %v3687_v55 = vrot.slane %v3685_v62, 1  ;;  %1214 = vst [vmem:[#allocation7 + $0x158] sm:$0xff] %v1150_v17  ;;  %v3700_v37 = vld [vmem:[#allocation58_spill] sm:$0xff]  ;;  %v1276_v17 = vld [vmem:[#allocation2 + $0x180] sm:$0xff] }
  0xec   :  { %v1024_v24 = vmul.f32 %v736_v50, %v478_v30  ;;  %v3688_v33 = vrot.slane %v3683_v40, 1  ;;  %v961_v10 = vmul.f32 %v1274_v58, %v3689_v14  ;;  %v1151_v48 = vadd.f32 %v1087_v61, %v799_v9  ;;  %v3699_v30 = vld [vmem:[#allocation57_spill] sm:$0xff]  ;;  %v3703_v2 = vld [vmem:[#allocation54_spill] sm:$0xff]  ;;  %v3707_v61 = vld [vmem:[#allocation60_spill] sm:$0xff] }
  0xed   :  { %v576_v36 = vsel %vm561_vm0, %v3686_v45, %v3684_v49  ;;  %v314_v4 = vsel %vm2560_vm4, 0.0, %v3690_v3  ;;  %v480_v7 = vsel %vm2564_vm5, 0.0, %v3691_v59  ;;  %v3693_v42 = vrot.slane %v3692_v21, 7  ;;  %v3709_v49 = vld [vmem:[#allocation63_spill] sm:$0xff]  ;;  %v3710_v45 = vld [vmem:[#allocation61_spill] sm:$0xff] }
  0xee   :  { %v737_v52 = vsel %vm690_vm1, %v3688_v33, %v3687_v55  ;;  %v1088_v53 = vadd.f32 %v1024_v24, %v960_v12  ;;  %v801_v32 = vmul.f32 %v576_v36, %v313_v16  ;;  %v3695_v63 = vrot.slane %v3694_v43, 7  ;;  %1215 = vst [vmem:[#allocation7 + $0x160] sm:$0xff] %v1151_v48  ;;  %v3712_v55 = vld [vmem:[#allocation59_spill] sm:$0xff]  ;;  %v1277_v48 = vld [vmem:[#allocation2 + $0x188] sm:$0xff] }
  0xef   :  { %v1025_v51 = vmul.f32 %v737_v52, %v479_v57  ;;  %v3696_v27 = vrot.slane %v3694_v43, 1  ;;  %v3697_v9 = vrot.slane %v3692_v21, 1  ;;  %v962_v23 = vmul.f32 %v1275_v11, %v3698_v19  ;;  %v3708_v57 = vld [vmem:[#allocation62_spill] sm:$0xff]  ;;  %v3725_v11 = vld [vmem:[#allocation71_spill] sm:$0xff] }
  0xf0   :  { %v577_v56 = vsel %vm561_vm0, %v3695_v63, %v3693_v42  ;;  %v1152_v15 = vadd.f32 %v1088_v53, %v800_v44  ;;  %v315_v18 = vsel %vm2560_vm4, 0.0, %v3699_v30  ;;  %v481_v38 = vsel %vm2564_vm5, 0.0, %v3700_v37  ;;  %v3716_v53 = vld [vmem:[#allocation66_spill] sm:$0xff]  ;;  %v3718_v42 = vld [vmem:[#allocation68_spill] sm:$0xff]  ;;  %v3719_v63 = vld [vmem:[#allocation65_spill] sm:$0xff] }
  0xf1   :  { %v738_v0 = vsel %vm690_vm1, %v3697_v9, %v3696_v27  ;;  %v1089_v39 = vadd.f32 %v1025_v51, %v961_v10  ;;  %v802_v41 = vmul.f32 %v577_v56, %v314_v4  ;;  %v3702_v60 = vrot.slane %v3701_v13, 7  ;;  %v3717_v51 = vld [vmem:[#allocation67_spill] sm:$0xff]  ;;  %v3721_v27 = vld [vmem:[#allocation64_spill] sm:$0xff] }
  0xf2   :  { %v1026_v26 = vmul.f32 %v738_v0, %v480_v7  ;;  %v3704_v8 = vrot.slane %v3703_v2, 7  ;;  %1216 = vst [vmem:[#allocation7 + $0x168] sm:$0xff] %v1152_v15  ;;  %v3705_v54 = vrot.slane %v3703_v2, 1  ;;  %v3706_v12 = vrot.slane %v3701_v13, 1  ;;  %v3726_v37 = vld [vmem:[#allocation72_spill] sm:$0xff]  ;;  %v3727_v13 = vld [vmem:[#allocation73_spill] sm:$0xff] }
  0xf3   :  { %v1153_v20 = vadd.f32 %v1089_v39, %v801_v32  ;;  %v963_v44 = vmul.f32 %v1276_v17, %v3707_v61  ;;  %v316_v40 = vsel %vm2560_vm4, 0.0, %v3708_v57  ;;  %v482_v62 = vsel %vm2564_vm5, 0.0, %v3709_v49  ;;  %v3728_v2 = vld [vmem:[#allocation70_spill] sm:$0xff] }
  0xf4   :  { %v578_v50 = vsel %vm561_vm0, %v3704_v8, %v3702_v60  ;;  %v739_v34 = vsel %vm690_vm1, %v3706_v12, %v3705_v54  ;;  %v1090_v24 = vadd.f32 %v1026_v26, %v962_v23  ;;  %v3711_v36 = vrot.slane %v3710_v45, 7 }
  0xf5   :  { %v803_v16 = vmul.f32 %v578_v50, %v315_v18  ;;  %v1027_v28 = vmul.f32 %v739_v34, %v481_v38  ;;  %1217 = vst [vmem:[#allocation7 + $0x170] sm:$0xff] %v1153_v20  ;;  %v3713_v33 = vrot.slane %v3712_v55, 7  ;;  %v3714_v58 = vrot.slane %v3712_v55, 1  ;;  %v3730_v50 = vld [vmem:[#allocation69_spill] sm:$0xff] }
  0xf6   :  { %v3715_v14 = vrot.slane %v3710_v45, 1  ;;  %v964_v32 = vmul.f32 %v1277_v48, %v3716_v53  ;;  %v317_v3 = vsel %vm2560_vm4, 0.0, %v3717_v51  ;;  %v1154_v4 = vadd.f32 %v1090_v24, %v802_v41  ;;  %v3734_v24 = vld [vmem:[#allocation76_spill] sm:$0xff] }
  0xf7   :  { %v579_v52 = vsel %vm561_vm0, %v3713_v33, %v3711_v36  ;;  %v1091_v59 = vadd.f32 %v1027_v28, %v963_v44  ;;  %v483_v43 = vsel %vm2564_vm5, 0.0, %v3718_v42  ;;  %v3720_v56 = vrot.slane %v3719_v63, 7  ;;  %v3737_v36 = vld [vmem:[#allocation75_spill] sm:$0xff]  ;;  %v3739_v33 = vld [vmem:[#allocation74_spill] sm:$0xff]  ;;  %v3743_v51 = vld [vmem:[#allocation80_spill] sm:$0xff] }
  0xf8   :  { %v740_v10 = vsel %vm690_vm1, %v3715_v14, %v3714_v58  ;;  %v804_v7 = vmul.f32 %v579_v52, %v316_v40  ;;  %v3722_v9 = vrot.slane %v3721_v27, 7  ;;  %v3723_v15 = vrot.slane %v3721_v27, 1  ;;  %1218 = vst [vmem:[#allocation7 + $0x178] sm:$0xff] %v1154_v4  ;;  %v3735_v40 = vld [vmem:[#allocation77_spill] sm:$0xff]  ;;  %v3745_v42 = vld [vmem:[#allocation83_spill] sm:$0xff] }
  0xf9   :  { %v1028_v21 = vmul.f32 %v740_v10, %v482_v62  ;;  %v3724_v39 = vrot.slane %v3719_v63, 1  ;;  %v965_v19 = vmul.f32 %v3725_v11, %v3719_v63  ;;  %v1155_v23 = vadd.f32 %v1091_v59, %v803_v16  ;;  %v3736_v62 = vld [vmem:[#allocation78_spill] sm:$0xff]  ;;  %v3746_v63 = vld [vmem:[#allocation81_spill] sm:$0xff]  ;;  %v3748_v27 = vld [vmem:[#allocation79_spill] sm:$0xff] }
  0xfa   :  { %v580_v0 = vsel %vm561_vm0, %v3722_v9, %v3720_v56  ;;  %v318_v38 = vsel %vm2560_vm4, 0.0, %v3726_v37  ;;  %v484_v60 = vsel %vm2564_vm5, 0.0, %v3727_v13  ;;  %v3729_v8 = vrot.slane %v3728_v2, 7  ;;  %v3752_v11 = vld [vmem:[#allocation86_spill] sm:$0xff]  ;;  %v3754_v13 = vld [vmem:[#allocation88_spill] sm:$0xff] }
  0xfb   :  { %v741_v41 = vsel %vm690_vm1, %v3724_v39, %v3723_v15  ;;  %v1092_v26 = vadd.f32 %v1028_v21, %v964_v32  ;;  %v805_v30 = vmul.f32 %v580_v0, %v317_v3  ;;  %v3731_v20 = vrot.slane %v3730_v50, 7  ;;  %1219 = vst [vmem:[#allocation7 + $0x180] sm:$0xff] %v1155_v23  ;;  %v3753_v23 = vld [vmem:[#allocation87_spill] sm:$0xff] }
  0xfc   :  { %v1029_v18 = vmul.f32 %v741_v41, %v483_v43  ;;  %v3732_v12 = vrot.slane %v3730_v50, 1  ;;  %v3733_v34 = vrot.slane %v3728_v2, 1  ;;  %v966_v28 = vmul.f32 %v3734_v24, %v3728_v2  ;;  %v3755_v2 = vld [vmem:[#allocation85_spill] sm:$0xff]  ;;  %v3757_v50 = vld [vmem:[#allocation84_spill] sm:$0xff] }
  0xfd   :  { %v581_v54 = vsel %vm561_vm0, %v3731_v20, %v3729_v8  ;;  %v1156_v17 = vadd.f32 %v1092_v26, %v804_v7  ;;  %v319_v49 = vsel %vm2560_vm4, 0.0, %v3735_v40  ;;  %v485_v45 = vsel %vm2564_vm5, 0.0, %v3736_v62  ;;  %v3744_v7 = vld [vmem:[#allocation82_spill] sm:$0xff]  ;;  %v3762_v40 = vld [vmem:[#allocation92_spill] sm:$0xff]  ;;  %v3763_v62 = vld [vmem:[#allocation93_spill] sm:$0xff] }
  0xfe   :  { %v742_v16 = vsel %vm690_vm1, %v3733_v34, %v3732_v12  ;;  %v1093_v61 = vadd.f32 %v1029_v18, %v965_v19  ;;  %v806_v44 = vmul.f32 %v581_v54, %v318_v38  ;;  %v3738_v55 = vrot.slane %v3737_v36, 7 }
  0xff   :  { %v1030_v57 = vmul.f32 %v742_v16, %v484_v60  ;;  %v3740_v52 = vrot.slane %v3739_v33, 7  ;;  %1220 = vst [vmem:[#allocation7 + $0x188] sm:$0xff] %v1156_v17  ;;  %v3741_v10 = vrot.slane %v3739_v33, 1  ;;  %v3742_v48 = vrot.slane %v3737_v36, 1  ;;  %v3761_v17 = vld [vmem:[#allocation91_spill] sm:$0xff]  ;;  %v3766_v33 = vld [vmem:[#allocation89_spill] sm:$0xff] }
 0x100   :  { %v1157_v14 = vadd.f32 %v1093_v61, %v805_v30  ;;  %v967_v3 = vmul.f32 %v3743_v51, %v3737_v36  ;;  %v320_v21 = vsel %vm2560_vm4, 0.0, %v3744_v7  ;;  %v486_v43 = vsel %vm2564_vm5, 0.0, %v3745_v42  ;;  %v3764_v36 = vld [vmem:[#allocation90_spill] sm:$0xff]  ;;  %v3771_v7 = vld [vmem:[#allocation97_spill] sm:$0xff] }
 0x101   :  { %v582_v58 = vsel %vm561_vm0, %v3740_v52, %v3738_v55  ;;  %v743_v53 = vsel %vm690_vm1, %v3742_v48, %v3741_v10  ;;  %v1094_v4 = vadd.f32 %v1030_v57, %v966_v28  ;;  %v3747_v56 = vrot.slane %v3746_v63, 7  ;;  %v3772_v42 = vld [vmem:[#allocation98_spill] sm:$0xff] }
 0x102   :  { %v807_v32 = vmul.f32 %v582_v58, %v319_v49  ;;  %v1031_v59 = vmul.f32 %v743_v53, %v485_v45  ;;  %1221 = vst [vmem:[#allocation7 + $0x190] sm:$0xff] %v1157_v14  ;;  %v3749_v9 = vrot.slane %v3748_v27, 7  ;;  %v3750_v15 = vrot.slane %v3748_v27, 1  ;;  %v3775_v27 = vld [vmem:[#allocation94_spill] sm:$0xff] }
 0x103   :  { %v3751_v39 = vrot.slane %v3746_v63, 1  ;;  %v968_v19 = vmul.f32 %v3752_v11, %v3746_v63  ;;  %v321_v26 = vsel %vm2560_vm4, 0.0, %v3753_v23  ;;  %v1158_v30 = vadd.f32 %v1094_v4, %v806_v44  ;;  %v3773_v63 = vld [vmem:[#allocation95_spill] sm:$0xff]  ;;  %v3779_v23 = vld [vmem:[#allocation100_spill] sm:$0xff] }
 0x104   :  { %v583_v0 = vsel %vm561_vm0, %v3749_v9, %v3747_v56  ;;  %v1095_v18 = vadd.f32 %v1031_v59, %v967_v3  ;;  %v487_v60 = vsel %vm2564_vm5, 0.0, %v3754_v13  ;;  %v3756_v8 = vrot.slane %v3755_v2, 7  ;;  %v3770_v3 = vld [vmem:[#allocation96_spill] sm:$0xff]  ;;  %v3781_v13 = vld [vmem:[#allocation103_spill] sm:$0xff] }
 0x105   :  { %v744_v41 = vsel %vm690_vm1, %v3751_v39, %v3750_v15  ;;  %v808_v37 = vmul.f32 %v583_v0, %v320_v21  ;;  %v3758_v20 = vrot.slane %v3757_v50, 7  ;;  %v3759_v12 = vrot.slane %v3757_v50, 1  ;;  %1222 = vst [vmem:[#allocation7 + $0x198] sm:$0xff] %v1158_v30  ;;  %v3784_v50 = vld [vmem:[#allocation99_spill] sm:$0xff] }
 0x106   :  { %v1032_v38 = vmul.f32 %v744_v41, %v486_v43  ;;  %v3760_v34 = vrot.slane %v3755_v2, 1  ;;  %v969_v61 = vmul.f32 %v3761_v17, %v3755_v2  ;;  %v1159_v44 = vadd.f32 %v1095_v18, %v807_v32  ;;  %v3782_v2 = vld [vmem:[#allocation101_spill] sm:$0xff]  ;;  %v3788_v17 = vld [vmem:[#allocation106_spill] sm:$0xff] }
 0x107   :  { %v584_v54 = vsel %vm561_vm0, %v3758_v20, %v3756_v8  ;;  %v322_v49 = vsel %vm2560_vm4, 0.0, %v3762_v40  ;;  %v488_v45 = vsel %vm2564_vm5, 0.0, %v3763_v62  ;;  %v3765_v55 = vrot.slane %v3764_v36, 7  ;;  %v3790_v62 = vld [vmem:[#allocation108_spill] sm:$0xff] }
 0x108   :  { %v745_v16 = vsel %vm690_vm1, %v3760_v34, %v3759_v12  ;;  %v1096_v24 = vadd.f32 %v1032_v38, %v968_v19  ;;  %v809_v28 = vmul.f32 %v584_v54, %v321_v26  ;;  %v3767_v52 = vrot.slane %v3766_v33, 7  ;;  %1223 = vst [vmem:[#allocation7 + $0x1a0] sm:$0xff] %v1159_v44  ;;  %v3789_v44 = vld [vmem:[#allocation107_spill] sm:$0xff] }
 0x109   :  { %v1033_v57 = vmul.f32 %v745_v16, %v487_v60  ;;  %v3768_v14 = vrot.slane %v3766_v33, 1  ;;  %v3769_v10 = vrot.slane %v3764_v36, 1  ;;  %v970_v4 = vmul.f32 %v3770_v3, %v3764_v36  ;;  %v3791_v36 = vld [vmem:[#allocation105_spill] sm:$0xff]  ;;  %v3793_v33 = vld [vmem:[#allocation104_spill] sm:$0xff] }
 0x10a   :  { %v585_v58 = vsel %vm561_vm0, %v3767_v52, %v3765_v55  ;;  %v1160_v53 = vadd.f32 %v1096_v24, %v808_v37  ;;  %v323_v21 = vsel %vm2560_vm4, 0.0, %v3771_v7  ;;  %v489_v43 = vsel %vm2564_vm5, 0.0, %v3772_v42  ;;  %v3780_v37 = vld [vmem:[#allocation102_spill] sm:$0xff]  ;;  %v3798_v7 = vld [vmem:[#allocation112_spill] sm:$0xff]  ;;  %v3799_v42 = vld [vmem:[#allocation113_spill] sm:$0xff] }
 0x10b   :  { %v746_v48 = vsel %vm690_vm1, %v3769_v10, %v3768_v14  ;;  %v1097_v32 = vadd.f32 %v1033_v57, %v969_v61  ;;  %v810_v51 = vmul.f32 %v585_v58, %v322_v49  ;;  %v3774_v56 = vrot.slane %v3773_v63, 7 }
 0x10c   :  { %v1034_v59 = vmul.f32 %v746_v48, %v488_v45  ;;  %v3776_v9 = vrot.slane %v3775_v27, 7  ;;  %1224 = vst [vmem:[#allocation7 + $0x1a8] sm:$0xff] %v1160_v53  ;;  %v3777_v39 = vrot.slane %v3775_v27, 1  ;;  %v3778_v41 = vrot.slane %v3773_v63, 1  ;;  %v3797_v53 = vld [vmem:[#allocation111_spill] sm:$0xff]  ;;  %v3802_v27 = vld [vmem:[#allocation109_spill] sm:$0xff] }
 0x10d   :  { %v1161_v15 = vadd.f32 %v1097_v32, %v809_v28  ;;  %v971_v26 = vmul.f32 %v3779_v23, %v3773_v63  ;;  %v324_v38 = vsel %vm2560_vm4, 0.0, %v3780_v37  ;;  %v490_v60 = vsel %vm2564_vm5, 0.0, %v3781_v13  ;;  %v3800_v63 = vld [vmem:[#allocation110_spill] sm:$0xff]  ;;  %v3807_v37 = vld [vmem:[#allocation117_spill] sm:$0xff] }
 0x10e   :  { %v586_v0 = vsel %vm561_vm0, %v3776_v9, %v3774_v56  ;;  %v747_v11 = vsel %vm690_vm1, %v3778_v41, %v3777_v39  ;;  %v1098_v30 = vadd.f32 %v1034_v59, %v970_v4  ;;  %v3783_v8 = vrot.slane %v3782_v2, 7  ;;  %v3808_v13 = vld [vmem:[#allocation118_spill] sm:$0xff] }
 0x10f   :  { %v811_v19 = vmul.f32 %v586_v0, %v323_v21  ;;  %v1035_v18 = vmul.f32 %v747_v11, %v489_v43  ;;  %1225 = vst [vmem:[#allocation7 + $0x1b0] sm:$0xff] %v1161_v15  ;;  %v3785_v20 = vrot.slane %v3784_v50, 7  ;;  %v3786_v12 = vrot.slane %v3784_v50, 1  ;;  %v3811_v50 = vld [vmem:[#allocation114_spill] sm:$0xff] }
 0x110   :  { %v3787_v34 = vrot.slane %v3782_v2, 1  ;;  %v972_v61 = vmul.f32 %v3788_v17, %v3782_v2  ;;  %v325_v24 = vsel %vm2560_vm4, 0.0, %v3789_v44  ;;  %v1162_v28 = vadd.f32 %v1098_v30, %v810_v51  ;;  %v3809_v2 = vld [vmem:[#allocation115_spill] sm:$0xff] }
 0x111   :  { %v587_v54 = vsel %vm561_vm0, %v3785_v20, %v3783_v8  ;;  %v1099_v57 = vadd.f32 %v1035_v18, %v971_v26  ;;  %v491_v45 = vsel %vm2564_vm5, 0.0, %v3790_v62  ;;  %v3792_v55 = vrot.slane %v3791_v36, 7  ;;  %v3806_v26 = vld [vmem:[#allocation116_spill] sm:$0xff]  ;;  %v3815_v44 = vld [vmem:[#allocation119_spill] sm:$0xff]  ;;  %v3817_v62 = vld [vmem:[#allocation122_spill] sm:$0xff] }
 0x112   :  { %v748_v16 = vsel %vm690_vm1, %v3787_v34, %v3786_v12  ;;  %v812_v40 = vmul.f32 %v587_v54, %v324_v38  ;;  %v3794_v52 = vrot.slane %v3793_v33, 7  ;;  %v3795_v14 = vrot.slane %v3793_v33, 1  ;;  %1226 = vst [vmem:[#allocation7 + $0x1b8] sm:$0xff] %v1162_v28 }
 0x113   :  { %v1036_v49 = vmul.f32 %v748_v16, %v490_v60  ;;  %v3796_v10 = vrot.slane %v3791_v36, 1  ;;  %v973_v32 = vmul.f32 %v3797_v53, %v3791_v36  ;;  %v1163_v51 = vadd.f32 %v1099_v57, %v811_v19  ;;  %v3818_v36 = vld [vmem:[#allocation120_spill] sm:$0xff] }
 0x114   :  { %v588_v58 = vsel %vm561_vm0, %v3794_v52, %v3792_v55  ;;  %v326_v21 = vsel %vm2560_vm4, 0.0, %v3798_v7  ;;  %v492_v43 = vsel %vm2564_vm5, 0.0, %v3799_v42  ;;  %v3801_v56 = vrot.slane %v3800_v63, 7  ;;  %v3823_v53 = vld [vmem:[#allocation124_spill] sm:$0xff]  ;;  %v3824_v7 = vld [vmem:[#allocation125_spill] sm:$0xff] }
 0x115   :  { %v749_v48 = vsel %vm690_vm1, %v3796_v10, %v3795_v14  ;;  %v1100_v3 = vadd.f32 %v1036_v49, %v972_v61  ;;  %v813_v4 = vmul.f32 %v588_v58, %v325_v24  ;;  %v3803_v9 = vrot.slane %v3802_v27, 7  ;;  %1227 = vst [vmem:[#allocation7 + $0x1c0] sm:$0xff] %v1163_v51 }
 0x116   :  { %v1037_v59 = vmul.f32 %v749_v48, %v491_v45  ;;  %v3804_v15 = vrot.slane %v3802_v27, 1  ;;  %v3805_v39 = vrot.slane %v3800_v63, 1  ;;  %v974_v30 = vmul.f32 %v3806_v26, %v3800_v63 }
 0x117   :  { %v589_v0 = vsel %vm561_vm0, %v3803_v9, %v3801_v56  ;;  %v1164_v11 = vadd.f32 %v1100_v3, %v812_v40  ;;  %v327_v38 = vsel %vm2560_vm4, 0.0, %v3807_v37  ;;  %v493_v60 = vsel %vm2564_vm5, 0.0, %v3808_v13  ;;  %v3816_v40 = vld [vmem:[#allocation121_spill] sm:$0xff] }
 0x118   :  { %v750_v41 = vsel %vm690_vm1, %v3805_v39, %v3804_v15  ;;  %v1101_v19 = vadd.f32 %v1037_v59, %v973_v32  ;;  %v814_v23 = vmul.f32 %v589_v0, %v326_v21  ;;  %v3810_v8 = vrot.slane %v3809_v2, 7  ;;  %v3825_v21 = vld [vmem:[#allocation123_spill] sm:$0xff] }
 0x119   :  { %v1038_v18 = vmul.f32 %v750_v41, %v492_v43  ;;  %v3812_v20 = vrot.slane %v3811_v50, 7  ;;  %1228 = vst [vmem:[#allocation7 + $0x1c8] sm:$0xff] %v1164_v11  ;;  %v3813_v34 = vrot.slane %v3811_v50, 1  ;;  %v3814_v16 = vrot.slane %v3809_v2, 1 }
 0x11a   :  { %v1165_v12 = vadd.f32 %v1101_v19, %v813_v4  ;;  %v975_v24 = vmul.f32 %v3815_v44, %v3809_v2  ;;  %v328_v49 = vsel %vm2560_vm4, 0.0, %v3816_v40  ;;  %v494_v45 = vsel %vm2564_vm5, 0.0, %v3817_v62  ;;  %v3830_v19 = vld [vmem:[#allocation127_spill] sm:$0xff] }
 0x11b   :  { %v590_v54 = vsel %vm561_vm0, %v3812_v20, %v3810_v8  ;;  %v751_v17 = vsel %vm690_vm1, %v3814_v16, %v3813_v34  ;;  %v1102_v28 = vadd.f32 %v1038_v18, %v974_v30  ;;  %v3819_v55 = vrot.slane %v3818_v36, 7 }
 0x11c   :  { %v815_v61 = vmul.f32 %v590_v54, %v327_v38  ;;  %v1039_v57 = vmul.f32 %v751_v17, %v493_v60  ;;  %1229 = vst [vmem:[#allocation7 + $0x1d0] sm:$0xff] %v1165_v12  ;;  %v3820_v33 = vrot.slane %v2422_v5, 7  ;;  %v3821_v58 = vrot.slane %v2422_v5, 1 }
 0x11d   :  { %v3822_v14 = vrot.slane %v3818_v36, 1  ;;  %v976_v48 = vmul.f32 %v2466_v31, %v3818_v36  ;;  %v329_v32 = vsel %vm2560_vm4, 0.0, %v3823_v53  ;;  %v1166_v51 = vadd.f32 %v1102_v28, %v814_v23  ;;  %v3831_v23 = vld [vmem:[#allocation126_spill] sm:$0xff] }
 0x11e   :  { %v591_v52 = vsel %vm561_vm0, %v3820_v33, %v3819_v55  ;;  %v1103_v3 = vadd.f32 %v1039_v57, %v975_v24  ;;  %v495_v5 = vsel %vm2564_vm5, 0.0, %v3824_v7  ;;  %v3826_v42 = vrot.slane %v3825_v21, 7 }
 0x11f   :  { %v752_v10 = vsel %vm690_vm1, %v3822_v14, %v3821_v58  ;;  %v816_v4 = vmul.f32 %v591_v52, %v328_v49  ;;  %v3827_v43 = vrot.slane %v2456_v47, 7  ;;  %v3828_v31 = vrot.slane %v2456_v47, 1  ;;  %1230 = vst [vmem:[#allocation7 + $0x1d8] sm:$0xff] %v1166_v51 }
 0x120   :  { %v1040_v59 = vmul.f32 %v752_v10, %v494_v45  ;;  %v3829_v56 = vrot.slane %v3825_v21, 1  ;;  %v977_v9 = vmul.f32 %v2500_v35, %v3825_v21  ;;  %v1167_v0 = vadd.f32 %v1103_v3, %v815_v61 }
 0x121   :  { %v592_v63 = vsel %vm561_vm0, %v3827_v43, %v3826_v42  ;;  %v330_v11 = vsel %vm2560_vm4, 0.0, %v2502_v25  ;;  %v496_v47 = vsel %vm2564_vm5, 0.0, %v3830_v19  ;;  %v3832_v26 = vrot.slane %v3831_v23, 7 }
 0x122   :  { %v753_v27 = vsel %vm690_vm1, %v3829_v56, %v3828_v31  ;;  %v1104_v15 = vadd.f32 %v1040_v59, %v976_v48  ;;  %v817_v39 = vmul.f32 %v592_v63, %v329_v32  ;;  %v3833_v30 = vrot.slane %v2496_v46, 7  ;;  %1231 = vst [vmem:[#allocation7 + $0x1e0] sm:$0xff] %v1167_v0 }
 0x123   :  { %v1041_v41 = vmul.f32 %v753_v27, %v495_v5  ;;  %v3834_v18 = vrot.slane %v2496_v46, 1  ;;  %v3835_v37 = vrot.slane %v3831_v23, 1  ;;  %v978_v22 = vmul.f32 %v2537_v29, %v3831_v23 }
 0x124   :  { %v593_v35 = vsel %vm561_vm0, %v3833_v30, %v3832_v26  ;;  %v1168_v25 = vadd.f32 %v1104_v15, %v816_v4 }
 0x125   :  { %v754_v38 = vsel %vm690_vm1, %v3835_v37, %v3834_v18  ;;  %v1105_v6 = vadd.f32 %v1041_v41, %v977_v9  ;;  %v818_v13 = vmul.f32 %v593_v35, %v330_v11 }
 0x126   :  { %v1042_v60 = vmul.f32 %v754_v38, %v496_v47  ;;  %1232 = vst [vmem:[#allocation7 + $0x1e8] sm:$0xff] %v1168_v25 }
 0x127   :  { %v1169_v2 = vadd.f32 %v1105_v6, %v817_v39 }
 0x128   :  { %v1106_v46 = vadd.f32 %v1042_v60, %v978_v22 }
 0x129   :  { %1233 = vst [vmem:[#allocation7 + $0x1f0] sm:$0xff] %v1169_v2 }
 0x12a   :  { %v1170_v1 = vadd.f32 %v1106_v46, %v818_v13 }
 0x12c   :  { %1234 = vst [vmem:[#allocation7 + $0x1f8] sm:$0xff] %v1170_v1 }
 0x12d   :  { %1247 = dma.vmem_to_hbm [thread:$0]  %s1240_s1, 8192, %s1242_s23, [#allocation4], %s1357_s17, %s1357_s17, %s1358_s18  }
 0x12e   :  { %1354 = dma.done.wait [#allocation4], 8192  }
 0x12f   :  { %1355 = vsyncadd [#allocation4], 4294959104 }
 0x130   :  { %1252 = vsyncpa [#allocation3], 1 }
 0x131   :  { %1253 = vsyncpa [#allocation6], 1 }
 0x132   :  { %1254 = vsyncpa [#allocation4], 1 }

</bundles_post_ra>
